<compile_context>
chip_gen: v7x
topology: tpu7x:2x2x1
jax: 0.10.0
libtpu: 0.0.40
codegen_flags: <defaults>
</compile_context>

<pallas_src>
import math

import jax
import jax.numpy as jnp
from jax.experimental import pallas as pl
from jax.experimental.pallas import tpu as pltpu

F32 = jnp.float32
BF16 = jnp.bfloat16
SQRT_HALF = 0.5 ** 0.5
LOG_10000 = math.log(10000.0)


def softsign(y):
    return y / (1.0 + jnp.abs(y))


# --------------------------------------------------------------------------------------
# Fully fused decoder kernel: Prenet -> causal gated conv stack -> attention (+residual)
# -> merged done/mel heads.  One grid step = one batch element; everything stays in VMEM.
# --------------------------------------------------------------------------------------
def _make_decoder_kernel(n_proj, n_conv, K, T_dec, T_text, H, head_pad, done_idx):
    inv_sqrt_h = float(1.0 / math.sqrt(float(H)))

    def kernel(*refs):
        (mel_ref, keys_ref, vals_ref, psb_ref, csb_ref, rates_ref,
         peq_ref, pek_ref, phase_ref) = refs[:9]
        cur = 9
        pren_w_refs = refs[cur:cur + n_proj]; cur += n_proj
        pren_b_ref = refs[cur]; cur += 1            # (n_proj, 1, H)        f32
        conv_w_ref = refs[cur]; cur += 1            # (n_conv*K, H, 2H)     bf16
        conv_b_ref = refs[cur]; cur += 1            # (n_conv, 1, 2H)       f32
        (wq_ref, bq_ref, wk_ref, bk_ref,
         wv_ref, bv_ref, wo_ref, bo_ref) = refs[cur:cur + 8]; cur += 8
        wh_ref, bh_ref = refs[cur], refs[cur + 1]; cur += 2
        attn_out_ref, head_out_ref = refs[cur], refs[cur + 1]; cur += 2
        conv_pad_sc = refs[cur]                     # (T_dec + K - 1, H)    f32 scratch

        b = pl.program_id(0)
        psb = psb_ref[0]                            # (n_proj, H) speaker bias (prenet)
        csb = csb_ref[0]                            # (n_conv, H) speaker bias (convs)

        # ---- Prenet ----
        x = mel_ref[0]                              # (T_dec, mel_dim) f32
        for i in range(n_proj):
            y = jnp.dot(x.astype(BF16), pren_w_refs[i][...],
                        preferred_element_type=jnp.float32)
            y = y + pren_b_ref[i] + psb[i:i + 1, :]
            x = jnp.maximum(y, 0.0)

        # ---- Causal gated conv blocks ----
        # tap j of layer i: conv[t - (K-1-j)].  The activation is stored at rows
        # [K-1, K-1+T_dec) of the scratch; rows [0, K-1) stay zero, so tap j is the
        # contiguous row window [j, j+T_dec) — a ref-slice load straight into the MXU.
        if K > 1:
            conv_pad_sc[0:K - 1, :] = jnp.zeros((K - 1, H), jnp.float32)
        conv = x                                    # (T_dec, H) f32
        for i in range(n_conv):
            conv_pad_sc[K - 1:K - 1 + T_dec, :] = conv
            acc = None
            for j in range(K):
                tap = conv_pad_sc[j:j + T_dec, :]                   # (T_dec, H)
                part = jnp.dot(tap.astype(BF16), conv_w_ref[i * K + j],
                               preferred_element_type=jnp.float32)  # (T_dec, 2H)
                acc = part if acc is None else acc + part
            acc = acc + conv_b_ref[i]
            vals = acc[:, :H]
            gates = acc[:, H:]
            conv = ((vals + csb[i:i + 1, :]) * jax.nn.sigmoid(gates) + conv) * SQRT_HALF

        # ---- Attention (+ DecoderCore residual sqrt(0.5)*(att_out + conv_out)) ----
        # pe = sin(rate * base + phase); phase = pi/2 on odd columns folds cos into sin.
        rate_q = rates_ref[b, 0]
        rate_k = rates_ref[b, 1]
        phase = phase_ref[...]                                      # (1, H)
        pe_q = jnp.sin(rate_q * peq_ref[...] + phase)               # (T_dec, H)
        pe_k = jnp.sin(rate_k * pek_ref[...] + phase)               # (T_text, H)

        q_in = (conv + pe_q).astype(BF16)
        k_in = (keys_ref[0] + pe_k).astype(BF16)
        q = jnp.dot(q_in, wq_ref[...], preferred_element_type=jnp.float32) + bq_ref[...]
        k = jnp.dot(k_in, wk_ref[...], preferred_element_type=jnp.float32) + bk_ref[...]
        v = jnp.dot(vals_ref[0].astype(BF16), wv_ref[...],
                    preferred_element_type=jnp.float32) + bv_ref[...]
        # Contract last dims of q and k (trans_b on the MXU; no explicit .T / XLU).
        scores = jax.lax.dot_general(
            q.astype(BF16), k.astype(BF16),
            dimension_numbers=(((1,), (1,)), ((), ())),
            preferred_element_type=jnp.float32) * inv_sqrt_h
        # NOTE: reference's masked_fill result is discarded -> no mask applied.
        m = jnp.max(scores, axis=-1, keepdims=True)
        e = jnp.exp(scores - m)
        denom = jnp.sum(e, axis=-1, keepdims=True)
        attn = e * pl.reciprocal(denom, approx=True)
        ctx = jnp.dot(attn.astype(BF16), v.astype(BF16),
                      preferred_element_type=jnp.float32) * inv_sqrt_h
        att_out = jnp.dot(ctx.astype(BF16), wo_ref[...],
                          preferred_element_type=jnp.float32) + bo_ref[...]
        attn_final = SQRT_HALF * (att_out + conv)
        attn_out_ref[0] = attn_final.astype(attn_out_ref.dtype)

        # ---- Merged done + mel heads (lane-padded slab; sigmoid only on done col) ----
        head = jnp.dot(attn_final.astype(BF16), wh_ref[...],
                       preferred_element_type=jnp.float32) + bh_ref[...]
        done_col = jax.nn.sigmoid(head[:, done_idx:done_idx + 1])   # (T_dec, 1) EUP only
        col = jax.lax.broadcasted_iota(jnp.int32, (T_dec, head_pad), 1)
        head = jnp.where(col == done_idx, done_col, head)
        head_out_ref[0] = head.astype(head_out_ref.dtype)

    return kernel


# --------------------------------------------------------------------------------------
# Parameter init (deterministic, synthetic).  Linear weights stored as (in, out) = W^T.
# --------------------------------------------------------------------------------------
def init_params(key, mel_dim, hidden, spk_dim, n_conv, n_proj, K, r):
    keys = iter(jax.random.split(key, 128))

    def nrm(shape, scale=0.1):
        return scale * jax.random.normal(next(keys), shape, dtype=F32)

    p = {"prenet": [], "convs": []}
    for i in range(n_proj):
        din = mel_dim if i == 0 else hidden
        p["prenet"].append(dict(w=nrm((din, hidden)), b=nrm((1, hidden), 0.01),
                                sw=nrm((spk_dim, hidden)), sb=nrm((1, hidden), 0.01)))
    for _ in range(n_conv):
        p["convs"].append(dict(w=nrm((K, hidden, 2 * hidden)), b=nrm((1, 2 * hidden), 0.01),
                               sw=nrm((spk_dim, hidden)), sb=nrm((1, hidden), 0.01)))
    # Attention: shared (eye + randn)/sqrt(H) weight for query_proj and key_proj.
    shared = (jnp.eye(hidden, dtype=F32)
              + jax.random.normal(next(keys), (hidden, hidden), dtype=F32)) / (hidden ** 0.5)
    p["attn"] = dict(
        wq=shared.T, bq=nrm((1, hidden), 0.01),
        wk=shared.T, bk=nrm((1, hidden), 0.01),
        wv=nrm((hidden, hidden)), bv=nrm((1, hidden), 0.01),
        wo=nrm((hidden, hidden)), bo=nrm((1, hidden), 0.01),
        sq_w=nrm((spk_dim, 1)), sq_b=nrm((1, 1), 0.01),
        sk_w=nrm((spk_dim, 1)), sk_b=nrm((1, 1), 0.01))
    p["done"] = dict(w=nrm((hidden, 1)), b=nrm((1, 1), 0.01))
    p["mel_fc"] = dict(w=nrm((hidden, mel_dim * r)), b=nrm((1, mel_dim * r), 0.01))
    return p


def _vmem_limit_bytes(B, T_dec, T_text, mel_dim, H, K, n_proj, n_conv, head_pad, cap):
    f32, bf16 = 4, 2
    per_batch = f32 * (T_dec * mel_dim + 2 * T_text * H + (n_proj + n_conv) * H)
    outs = f32 * (T_dec * H + T_dec * head_pad)
    weights = (bf16 * (mel_dim * H + max(n_proj - 1, 0) * H * H)   # prenet weights
               + f32 * n_proj * H                                   # prenet biases
               + bf16 * n_conv * K * H * 2 * H + f32 * n_conv * 2 * H
               + bf16 * 4 * H * H + f32 * 4 * H                     # attention projections
               + bf16 * H * head_pad + f32 * head_pad               # merged head
               + f32 * (T_dec + T_text + 1) * H)                    # PE tables
    scratch = f32 * (T_dec + K - 1) * H
    interm = f32 * (3 * T_dec * T_text + 2 * T_dec * 2 * H + 6 * T_dec * H)
    est = 2 * (per_batch + outs + weights) + scratch + interm       # 2x = double buffering
    return int(min(max(2 * est, 32 << 20), cap))


# --------------------------------------------------------------------------------------
# Decoder forward: one fused pallas_call, grid over batch (parallel).
# --------------------------------------------------------------------------------------
def decoder_forward(p, mel_specs, enc_keys, enc_values, speaker_emb, current_mel_pos,
                    hidden, mel_dim, r, K, out_dtype=F32, vmem_cap_bytes=100 << 20):
    # out_dtype=BF16 halves the writeback traffic (v5e HBM-bound tail) if downstream allows.
    # On v7x pass vmem_cap_bytes ~= 48<<20 (64 MiB physical VMEM per TensorCore).
    B, T_dec, _ = mel_specs.shape
    _, T_text, _ = enc_keys.shape
    H = hidden
    n_proj = len(p["prenet"])
    n_conv = len(p["convs"])
    head_n = mel_dim * r + 1
    head_pad = ((head_n + 127) // 128) * 128        # lane-dense head output slab
    done_idx = mel_dim * r
    a = p["attn"]

    # Tiny speaker-conditioning projections: plain XLA (not worth a kernel launch).
    psb = jnp.stack([softsign(speaker_emb @ l["sw"] + l["sb"]) for l in p["prenet"]],
                    axis=1)                                              # (B, n_proj, H)
    csb = jnp.stack([softsign(speaker_emb @ l["sw"] + l["sb"]) for l in p["convs"]],
                    axis=1)                                              # (B, n_conv, H)
    rate_q = jax.nn.sigmoid(speaker_emb @ a["sq_w"] + a["sq_b"])         # (B, 1)
    rate_k = jax.nn.sigmoid(speaker_emb @ a["sk_w"] + a["sk_b"])         # (B, 1)
    rates = jnp.concatenate([rate_q, rate_k], axis=1).astype(F32)       # (B, 2) -> SMEM

    # Grid-invariant positional-encoding tables (reference: div_term = 10000**(k/H)).
    kk = jnp.arange(H, dtype=F32)
    inv_div = jnp.exp(kk * (-LOG_10000 / float(H)))                      # 10000**(-k/H)
    pos_q = (jnp.arange(T_dec, dtype=F32) + float(current_mel_pos))[:, None]
    pos_k = jnp.arange(T_text, dtype=F32)[:, None]
    pe_base_q = pos_q * inv_div[None, :]                                 # (T_dec, H)
    pe_base_k = pos_k * inv_div[None, :]                                 # (T_text, H)
    pe_phase = jnp.where(jnp.arange(H) % 2 == 0, 0.0, math.pi / 2.0
                         ).astype(F32)[None, :]                          # (1, H)

    # Weight packing: bf16 for MXU operands; biases / tables stay f32.
    pren_w = [l["w"].astype(BF16) for l in p["prenet"]]
    pren_b = jnp.stack([l["b"] for l in p["prenet"]], axis=0)            # (n_proj, 1, H)
    conv_w = jnp.concatenate([l["w"] for l in p["convs"]],
                             axis=0).astype(BF16)                        # (n_conv*K, H, 2H)
    conv_b = jnp.stack([l["b"] for l in p["convs"]], axis=0)             # (n_conv, 1, 2H)
    # Merged mel+done head, zero-padded to a multiple of 128 output columns.
    w_head = jnp.zeros((H, head_pad), F32)
    w_head = w_head.at[:, :mel_dim * r].set(p["mel_fc"]["w"])
    w_head = w_head.at[:, done_idx:done_idx + 1].set(p["done"]["w"]).astype(BF16)
    b_head = jnp.zeros((1, head_pad), F32)
    b_head = b_head.at[:, :mel_dim * r].set(p["mel_fc"]["b"])
    b_head = b_head.at[:, done_idx:done_idx + 1].set(p["done"]["b"])

    kernel = _make_decoder_kernel(n_proj, n_conv, K, T_dec, T_text, H, head_pad, done_idx)

    def full2(shape):
        return pl.BlockSpec(shape, lambda b: (0, 0))

    def full3(shape):
        return pl.BlockSpec(shape, lambda b: (0, 0, 0))

    def perb3(shape):
        return pl.BlockSpec(shape, lambda b: (b, 0, 0))

    in_specs = [
        perb3((1, T_dec, mel_dim)),                       # mel_specs
        perb3((1, T_text, H)),                            # enc_keys
        perb3((1, T_text, H)),                            # enc_values
        perb3((1, n_proj, H)),                            # psb
        perb3((1, n_conv, H)),                            # csb
        pl.BlockSpec(memory_space=pltpu.MemorySpace.SMEM),  # rates (B, 2) scalars
        full2((T_dec, H)),                                # pe_base_q
        full2((T_text, H)),                               # pe_base_k
        full2((1, H)),                                    # pe_phase
    ]
    in_specs += [full2(w.shape) for w in pren_w]
    in_specs += [
        full3(pren_b.shape), full3(conv_w.shape), full3(conv_b.shape),
        full2((H, H)), full2((1, H)),                     # wq, bq
        full2((H, H)), full2((1, H)),                     # wk, bk
        full2((H, H)), full2((1, H)),                     # wv, bv
        full2((H, H)), full2((1, H)),                     # wo, bo
        full2((H, head_pad)), full2((1, head_pad)),       # merged head
    ]

    vmem_limit = _vmem_limit_bytes(B, T_dec, T_text, mel_dim, H, K, n_proj, n_conv,
                                   head_pad, vmem_cap_bytes)

    attn_out, head_out = pl.pallas_call(
        kernel,
        out_shape=(jax.ShapeDtypeStruct((B, T_dec, H), out_dtype),
                   jax.ShapeDtypeStruct((B, T_dec, head_pad), out_dtype)),
        grid=(B,),
        in_specs=in_specs,
        out_specs=(perb3((1, T_dec, H)), perb3((1, T_dec, head_pad))),
        scratch_shapes=[pltpu.VMEM((T_dec + K - 1, H), F32)],
        compiler_params=pltpu.CompilerParams(
            dimension_semantics=("parallel",),
            vmem_limit_bytes=vmem_limit),
    )(mel_specs, enc_keys, enc_values, psb, csb, rates, pe_base_q, pe_base_k, pe_phase,
      *pren_w, pren_b, conv_w, conv_b,
      a["wq"].astype(BF16), a["bq"], a["wk"].astype(BF16), a["bk"],
      a["wv"].astype(BF16), a["bv"], a["wo"].astype(BF16), a["bo"],
      w_head, b_head)

    mel_out = head_out[..., :mel_dim * r].reshape(B, T_dec * r, mel_dim)
    done_out = head_out[..., done_idx:done_idx + 1]   # sigmoid already applied in-kernel
    return attn_out, mel_out, done_out


if __name__ == "__main__":
    B, T_dec, T_text = 2, 8, 8
    mel_dim, hidden, spk_dim = 4, 32, 8
    n_conv, n_proj, reduction, kernel_size = 2, 2, 2, 3

    key = jax.random.PRNGKey(0)
    kp, k1, k2, k3, k4 = jax.random.split(key, 5)
    params = init_params(kp, mel_dim, hidden, spk_dim, n_conv, n_proj,
                         kernel_size, reduction)

    mel_specs = jax.random.normal(k1, (B, T_dec, mel_dim), dtype=F32)
    encoder_keys = jax.random.normal(k2, (B, T_text, hidden), dtype=F32)
    encoder_values = jax.random.normal(k3, (B, T_text, hidden), dtype=F32)
    speaker_embedding = jax.random.normal(k4, (B, spk_dim), dtype=F32)

    attn_out, mel_out, done_out = decoder_forward(
        params, mel_specs, encoder_keys, encoder_values, speaker_embedding,
        current_mel_pos=0, hidden=hidden, mel_dim=mel_dim, r=reduction, K=kernel_size)

    jax.block_until_ready((attn_out, mel_out, done_out))
    assert attn_out.shape == (B, T_dec, hidden)
    assert mel_out.shape == (B, T_dec * reduction, mel_dim)
    assert done_out.shape == (B, T_dec, 1)
    print("KERNEL_OK")
</pallas_src>

<mosaic_0001>
module attributes {stable_mosaic.version = 11 : i64} {
  func.func @kernel(%arg0: i32, %arg1: memref<1x8x4xf32, #tpu.memory_space<vmem>>, %arg2: memref<1x8x32xf32, #tpu.memory_space<vmem>>, %arg3: memref<1x8x32xf32, #tpu.memory_space<vmem>>, %arg4: memref<1x2x32xf32, #tpu.memory_space<vmem>>, %arg5: memref<1x2x32xf32, #tpu.memory_space<vmem>>, %arg6: memref<2x2xf32, #tpu.memory_space<smem>>, %arg7: memref<8x32xf32, #tpu.memory_space<vmem>>, %arg8: memref<8x32xf32, #tpu.memory_space<vmem>>, %arg9: memref<1x32xf32, #tpu.memory_space<vmem>>, %arg10: memref<4x32xbf16, #tpu.memory_space<vmem>>, %arg11: memref<32x32xbf16, #tpu.memory_space<vmem>>, %arg12: memref<2x1x32xf32, #tpu.memory_space<vmem>>, %arg13: memref<6x32x64xbf16, #tpu.memory_space<vmem>>, %arg14: memref<2x1x64xf32, #tpu.memory_space<vmem>>, %arg15: memref<32x32xbf16, #tpu.memory_space<vmem>>, %arg16: memref<1x32xf32, #tpu.memory_space<vmem>>, %arg17: memref<32x32xbf16, #tpu.memory_space<vmem>>, %arg18: memref<1x32xf32, #tpu.memory_space<vmem>>, %arg19: memref<32x32xbf16, #tpu.memory_space<vmem>>, %arg20: memref<1x32xf32, #tpu.memory_space<vmem>>, %arg21: memref<32x32xbf16, #tpu.memory_space<vmem>>, %arg22: memref<1x32xf32, #tpu.memory_space<vmem>>, %arg23: memref<32x128xbf16, #tpu.memory_space<vmem>>, %arg24: memref<1x128xf32, #tpu.memory_space<vmem>>, %arg25: memref<1x8x32xf32, #tpu.memory_space<vmem>>, %arg26: memref<1x8x128xf32, #tpu.memory_space<vmem>>, %arg27: memref<10x32xf32, #tpu.memory_space<vmem>>) attributes {dimension_semantics = [#tpu.dimension_semantics<parallel>], iteration_bounds = array<i64: 2>, scalar_prefetch = 0 : i64, scratch_operands = 1 : i64, tpu.core_type = #tpu.core_type<tc>, window_params = [{transform_indices = @transform_0, window_bounds = array<i64: 1, 8, 4>}, {transform_indices = @transform_1, window_bounds = array<i64: 1, 8, 32>}, {transform_indices = @transform_2, window_bounds = array<i64: 1, 8, 32>}, {transform_indices = @transform_3, window_bounds = array<i64: 1, 2, 32>}, {transform_indices = @transform_4, window_bounds = array<i64: 1, 2, 32>}, {transform_indices = @transform_5, window_bounds = array<i64: 2, 2>}, {pipeline_mode = #tpu.pipeline_mode<synchronous>, transform_indices = @transform_6, window_bounds = array<i64: 8, 32>}, {pipeline_mode = #tpu.pipeline_mode<synchronous>, transform_indices = @transform_7, window_bounds = array<i64: 8, 32>}, {pipeline_mode = #tpu.pipeline_mode<synchronous>, transform_indices = @transform_8, window_bounds = array<i64: 1, 32>}, {pipeline_mode = #tpu.pipeline_mode<synchronous>, transform_indices = @transform_9, window_bounds = array<i64: 4, 32>}, {pipeline_mode = #tpu.pipeline_mode<synchronous>, transform_indices = @transform_10, window_bounds = array<i64: 32, 32>}, {pipeline_mode = #tpu.pipeline_mode<synchronous>, transform_indices = @transform_11, window_bounds = array<i64: 2, 1, 32>}, {pipeline_mode = #tpu.pipeline_mode<synchronous>, transform_indices = @transform_12, window_bounds = array<i64: 6, 32, 64>}, {pipeline_mode = #tpu.pipeline_mode<synchronous>, transform_indices = @transform_13, window_bounds = array<i64: 2, 1, 64>}, {pipeline_mode = #tpu.pipeline_mode<synchronous>, transform_indices = @transform_14, window_bounds = array<i64: 32, 32>}, {pipeline_mode = #tpu.pipeline_mode<synchronous>, transform_indices = @transform_15, window_bounds = array<i64: 1, 32>}, {pipeline_mode = #tpu.pipeline_mode<synchronous>, transform_indices = @transform_16, window_bounds = array<i64: 32, 32>}, {pipeline_mode = #tpu.pipeline_mode<synchronous>, transform_indices = @transform_17, window_bounds = array<i64: 1, 32>}, {pipeline_mode = #tpu.pipeline_mode<synchronous>, transform_indices = @transform_18, window_bounds = array<i64: 32, 32>}, {pipeline_mode = #tpu.pipeline_mode<synchronous>, transform_indices = @transform_19, window_bounds = array<i64: 1, 32>}, {pipeline_mode = #tpu.pipeline_mode<synchronous>, transform_indices = @transform_20, window_bounds = array<i64: 32, 32>}, {pipeline_mode = #tpu.pipeline_mode<synchronous>, transform_indices = @transform_21, window_bounds = array<i64: 1, 32>}, {pipeline_mode = #tpu.pipeline_mode<synchronous>, transform_indices = @transform_22, window_bounds = array<i64: 32, 128>}, {pipeline_mode = #tpu.pipeline_mode<synchronous>, transform_indices = @transform_23, window_bounds = array<i64: 1, 128>}, {transform_indices = @transform_24, window_bounds = array<i64: 1, 8, 32>}, {transform_indices = @transform_25, window_bounds = array<i64: 1, 8, 128>}]} {
    %c0 = arith.constant 0 : index
    %c0_0 = arith.constant 0 : index
    %c0_1 = arith.constant 0 : index
    %0 = vector.load %arg4[%c0, %c0_0, %c0_1] : memref<1x2x32xf32, #tpu.memory_space<vmem>>, vector<1x2x32xf32>
    %1 = vector.shape_cast %0 : vector<1x2x32xf32> to vector<2x32xf32>
    %c0_2 = arith.constant 0 : index
    %c0_3 = arith.constant 0 : index
    %c0_4 = arith.constant 0 : index
    %2 = vector.load %arg5[%c0_2, %c0_3, %c0_4] : memref<1x2x32xf32, #tpu.memory_space<vmem>>, vector<1x2x32xf32>
    %3 = vector.shape_cast %2 : vector<1x2x32xf32> to vector<2x32xf32>
    %c0_5 = arith.constant 0 : index
    %c0_6 = arith.constant 0 : index
    %c0_7 = arith.constant 0 : index
    %4 = vector.load %arg1[%c0_5, %c0_6, %c0_7] : memref<1x8x4xf32, #tpu.memory_space<vmem>>, vector<1x8x4xf32>
    %5 = vector.shape_cast %4 : vector<1x8x4xf32> to vector<8x4xf32>
    %6 = arith.truncf %5 : vector<8x4xf32> to vector<8x4xbf16>
    %c0_8 = arith.constant 0 : index
    %c0_9 = arith.constant 0 : index
    %7 = vector.load %arg10[%c0_8, %c0_9] : memref<4x32xbf16, #tpu.memory_space<vmem>>, vector<4x32xbf16>
    %cst = arith.constant dense<0.000000e+00> : vector<8x32xf32>
    %8 = tpu.matmul %6, %7, %cst {dimension_numbers = #tpu.dot_dimension_numbers<[1], [0], [0], [1], [0, 0, 1, 1], [], []>} : vector<8x4xbf16>, vector<4x32xbf16>, vector<8x32xf32> -> vector<8x32xf32>
    %c0_10 = arith.constant 0 : index
    %c0_11 = arith.constant 0 : index
    %c0_12 = arith.constant 0 : index
    %9 = vector.load %arg12[%c0_10, %c0_11, %c0_12] : memref<2x1x32xf32, #tpu.memory_space<vmem>>, vector<1x1x32xf32>
    %10 = vector.shape_cast %9 : vector<1x1x32xf32> to vector<1x32xf32>
    %11 = vector.broadcast %10 : vector<1x32xf32> to vector<8x32xf32>
    %12 = arith.addf %8, %11 : vector<8x32xf32>
    %13 = vector.extract_strided_slice %1 {offsets = [0, 0], sizes = [1, 32], strides = [1, 1]} : vector<2x32xf32> to vector<1x32xf32>
    %14 = vector.broadcast %13 : vector<1x32xf32> to vector<8x32xf32>
    %15 = arith.addf %12, %14 : vector<8x32xf32>
    %cst_13 = arith.constant 0.000000e+00 : f32
    %16 = vector.broadcast %cst_13 : f32 to vector<8x32xf32>
    %17 = arith.maximumf %15, %16 : vector<8x32xf32>
    %18 = arith.truncf %17 : vector<8x32xf32> to vector<8x32xbf16>
    %c0_14 = arith.constant 0 : index
    %c0_15 = arith.constant 0 : index
    %19 = vector.load %arg11[%c0_14, %c0_15] : memref<32x32xbf16, #tpu.memory_space<vmem>>, vector<32x32xbf16>
    %cst_16 = arith.constant dense<0.000000e+00> : vector<8x32xf32>
    %20 = tpu.matmul %18, %19, %cst_16 {dimension_numbers = #tpu.dot_dimension_numbers<[1], [0], [0], [1], [0, 0, 1, 1], [], []>} : vector<8x32xbf16>, vector<32x32xbf16>, vector<8x32xf32> -> vector<8x32xf32>
    %c1 = arith.constant 1 : index
    %c0_17 = arith.constant 0 : index
    %c0_18 = arith.constant 0 : index
    %21 = vector.load %arg12[%c1, %c0_17, %c0_18] : memref<2x1x32xf32, #tpu.memory_space<vmem>>, vector<1x1x32xf32>
    %22 = vector.shape_cast %21 : vector<1x1x32xf32> to vector<1x32xf32>
    %23 = vector.broadcast %22 : vector<1x32xf32> to vector<8x32xf32>
    %24 = arith.addf %20, %23 : vector<8x32xf32>
    %25 = vector.extract_strided_slice %1 {offsets = [1, 0], sizes = [1, 32], strides = [1, 1]} : vector<2x32xf32> to vector<1x32xf32>
    %26 = vector.broadcast %25 : vector<1x32xf32> to vector<8x32xf32>
    %27 = arith.addf %24, %26 : vector<8x32xf32>
    %cst_19 = arith.constant 0.000000e+00 : f32
    %28 = vector.broadcast %cst_19 : f32 to vector<8x32xf32>
    %29 = arith.maximumf %27, %28 : vector<8x32xf32>
    %cst_20 = arith.constant 0.000000e+00 : f32
    %30 = vector.broadcast %cst_20 : f32 to vector<2x32xf32>
    %c0_21 = arith.constant 0 : index
    %c0_22 = arith.constant 0 : index
    %31 = vector.load %arg27[%c0_21, %c0_22] : memref<10x32xf32, #tpu.memory_space<vmem>>, vector<2x32xf32>
    tpu.vector_store %arg27[%c0_21, %c0_22], %30 {strides = array<i32>} : memref<10x32xf32, #tpu.memory_space<vmem>>, vector<2x32xf32>,
    %c2 = arith.constant 2 : index
    %c0_23 = arith.constant 0 : index
    %32 = vector.load %arg27[%c2, %c0_23] : memref<10x32xf32, #tpu.memory_space<vmem>>, vector<8x32xf32>
    tpu.vector_store %arg27[%c2, %c0_23], %29 {strides = array<i32>} : memref<10x32xf32, #tpu.memory_space<vmem>>, vector<8x32xf32>,
    %c0_24 = arith.constant 0 : index
    %c0_25 = arith.constant 0 : index
    %33 = vector.load %arg27[%c0_24, %c0_25] : memref<10x32xf32, #tpu.memory_space<vmem>>, vector<8x32xf32>
    %34 = arith.truncf %33 : vector<8x32xf32> to vector<8x32xbf16>
    %c0_26 = arith.constant 0 : index
    %c0_27 = arith.constant 0 : index
    %c0_28 = arith.constant 0 : index
    %35 = vector.load %arg13[%c0_26, %c0_27, %c0_28] : memref<6x32x64xbf16, #tpu.memory_space<vmem>>, vector<1x32x64xbf16>
    %36 = vector.shape_cast %35 : vector<1x32x64xbf16> to vector<32x64xbf16>
    %cst_29 = arith.constant dense<0.000000e+00> : vector<8x64xf32>
    %37 = tpu.matmul %34, %36, %cst_29 {dimension_numbers = #tpu.dot_dimension_numbers<[1], [0], [0], [1], [0, 0, 1, 1], [], []>} : vector<8x32xbf16>, vector<32x64xbf16>, vector<8x64xf32> -> vector<8x64xf32>
    %c1_30 = arith.constant 1 : index
    %c0_31 = arith.constant 0 : index
    %38 = vector.load %arg27[%c1_30, %c0_31] : memref<10x32xf32, #tpu.memory_space<vmem>>, vector<8x32xf32>
    %39 = arith.truncf %38 : vector<8x32xf32> to vector<8x32xbf16>
    %c1_32 = arith.constant 1 : index
    %c0_33 = arith.constant 0 : index
    %c0_34 = arith.constant 0 : index
    %40 = vector.load %arg13[%c1_32, %c0_33, %c0_34] : memref<6x32x64xbf16, #tpu.memory_space<vmem>>, vector<1x32x64xbf16>
    %41 = vector.shape_cast %40 : vector<1x32x64xbf16> to vector<32x64xbf16>
    %cst_35 = arith.constant dense<0.000000e+00> : vector<8x64xf32>
    %42 = tpu.matmul %39, %41, %cst_35 {dimension_numbers = #tpu.dot_dimension_numbers<[1], [0], [0], [1], [0, 0, 1, 1], [], []>} : vector<8x32xbf16>, vector<32x64xbf16>, vector<8x64xf32> -> vector<8x64xf32>
    %43 = arith.addf %37, %42 : vector<8x64xf32>
    %c2_36 = arith.constant 2 : index
    %c0_37 = arith.constant 0 : index
    %44 = vector.load %arg27[%c2_36, %c0_37] : memref<10x32xf32, #tpu.memory_space<vmem>>, vector<8x32xf32>
    %45 = arith.truncf %44 : vector<8x32xf32> to vector<8x32xbf16>
    %c2_38 = arith.constant 2 : index
    %c0_39 = arith.constant 0 : index
    %c0_40 = arith.constant 0 : index
    %46 = vector.load %arg13[%c2_38, %c0_39, %c0_40] : memref<6x32x64xbf16, #tpu.memory_space<vmem>>, vector<1x32x64xbf16>
    %47 = vector.shape_cast %46 : vector<1x32x64xbf16> to vector<32x64xbf16>
    %cst_41 = arith.constant dense<0.000000e+00> : vector<8x64xf32>
    %48 = tpu.matmul %45, %47, %cst_41 {dimension_numbers = #tpu.dot_dimension_numbers<[1], [0], [0], [1], [0, 0, 1, 1], [], []>} : vector<8x32xbf16>, vector<32x64xbf16>, vector<8x64xf32> -> vector<8x64xf32>
    %49 = arith.addf %43, %48 : vector<8x64xf32>
    %c0_42 = arith.constant 0 : index
    %c0_43 = arith.constant 0 : index
    %c0_44 = arith.constant 0 : index
    %50 = vector.load %arg14[%c0_42, %c0_43, %c0_44] : memref<2x1x64xf32, #tpu.memory_space<vmem>>, vector<1x1x64xf32>
    %51 = vector.shape_cast %50 : vector<1x1x64xf32> to vector<1x64xf32>
    %52 = vector.broadcast %51 : vector<1x64xf32> to vector<8x64xf32>
    %53 = arith.addf %49, %52 : vector<8x64xf32>
    %54 = vector.extract_strided_slice %53 {offsets = [0, 0], sizes = [8, 32], strides = [1, 1]} : vector<8x64xf32> to vector<8x32xf32>
    %55 = vector.extract_strided_slice %53 {offsets = [0, 32], sizes = [8, 32], strides = [1, 1]} : vector<8x64xf32> to vector<8x32xf32>
    %56 = vector.extract_strided_slice %3 {offsets = [0, 0], sizes = [1, 32], strides = [1, 1]} : vector<2x32xf32> to vector<1x32xf32>
    %57 = vector.broadcast %56 : vector<1x32xf32> to vector<8x32xf32>
    %58 = arith.addf %54, %57 : vector<8x32xf32>
    %59 = arith.negf %55 : vector<8x32xf32>
    %60 = math.exp %59 : vector<8x32xf32>
    %cst_45 = arith.constant 1.000000e+00 : f32
    %61 = vector.broadcast %cst_45 : f32 to vector<8x32xf32>
    %62 = arith.addf %61, %60 : vector<8x32xf32>
    %63 = arith.divf %61, %62 : vector<8x32xf32>
    %64 = arith.mulf %58, %63 : vector<8x32xf32>
    %65 = arith.addf %64, %29 : vector<8x32xf32>
    %cst_46 = arith.constant 0.707106769 : f32
    %66 = vector.broadcast %cst_46 : f32 to vector<8x32xf32>
    %67 = arith.mulf %65, %66 : vector<8x32xf32>
    %c2_47 = arith.constant 2 : index
    %c0_48 = arith.constant 0 : index
    %68 = vector.load %arg27[%c2_47, %c0_48] : memref<10x32xf32, #tpu.memory_space<vmem>>, vector<8x32xf32>
    tpu.vector_store %arg27[%c2_47, %c0_48], %67 {strides = array<i32>} : memref<10x32xf32, #tpu.memory_space<vmem>>, vector<8x32xf32>,
    %c0_49 = arith.constant 0 : index
    %c0_50 = arith.constant 0 : index
    %69 = vector.load %arg27[%c0_49, %c0_50] : memref<10x32xf32, #tpu.memory_space<vmem>>, vector<8x32xf32>
    %70 = arith.truncf %69 : vector<8x32xf32> to vector<8x32xbf16>
    %c3 = arith.constant 3 : index
    %c0_51 = arith.constant 0 : index
    %c0_52 = arith.constant 0 : index
    %71 = vector.load %arg13[%c3, %c0_51, %c0_52] : memref<6x32x64xbf16, #tpu.memory_space<vmem>>, vector<1x32x64xbf16>
    %72 = vector.shape_cast %71 : vector<1x32x64xbf16> to vector<32x64xbf16>
    %cst_53 = arith.constant dense<0.000000e+00> : vector<8x64xf32>
    %73 = tpu.matmul %70, %72, %cst_53 {dimension_numbers = #tpu.dot_dimension_numbers<[1], [0], [0], [1], [0, 0, 1, 1], [], []>} : vector<8x32xbf16>, vector<32x64xbf16>, vector<8x64xf32> -> vector<8x64xf32>
    %c1_54 = arith.constant 1 : index
    %c0_55 = arith.constant 0 : index
    %74 = vector.load %arg27[%c1_54, %c0_55] : memref<10x32xf32, #tpu.memory_space<vmem>>, vector<8x32xf32>
    %75 = arith.truncf %74 : vector<8x32xf32> to vector<8x32xbf16>
    %c4 = arith.constant 4 : index
    %c0_56 = arith.constant 0 : index
    %c0_57 = arith.constant 0 : index
    %76 = vector.load %arg13[%c4, %c0_56, %c0_57] : memref<6x32x64xbf16, #tpu.memory_space<vmem>>, vector<1x32x64xbf16>
    %77 = vector.shape_cast %76 : vector<1x32x64xbf16> to vector<32x64xbf16>
    %cst_58 = arith.constant dense<0.000000e+00> : vector<8x64xf32>
    %78 = tpu.matmul %75, %77, %cst_58 {dimension_numbers = #tpu.dot_dimension_numbers<[1], [0], [0], [1], [0, 0, 1, 1], [], []>} : vector<8x32xbf16>, vector<32x64xbf16>, vector<8x64xf32> -> vector<8x64xf32>
    %79 = arith.addf %73, %78 : vector<8x64xf32>
    %c2_59 = arith.constant 2 : index
    %c0_60 = arith.constant 0 : index
    %80 = vector.load %arg27[%c2_59, %c0_60] : memref<10x32xf32, #tpu.memory_space<vmem>>, vector<8x32xf32>
    %81 = arith.truncf %80 : vector<8x32xf32> to vector<8x32xbf16>
    %c5 = arith.constant 5 : index
    %c0_61 = arith.constant 0 : index
    %c0_62 = arith.constant 0 : index
    %82 = vector.load %arg13[%c5, %c0_61, %c0_62] : memref<6x32x64xbf16, #tpu.memory_space<vmem>>, vector<1x32x64xbf16>
    %83 = vector.shape_cast %82 : vector<1x32x64xbf16> to vector<32x64xbf16>
    %cst_63 = arith.constant dense<0.000000e+00> : vector<8x64xf32>
    %84 = tpu.matmul %81, %83, %cst_63 {dimension_numbers = #tpu.dot_dimension_numbers<[1], [0], [0], [1], [0, 0, 1, 1], [], []>} : vector<8x32xbf16>, vector<32x64xbf16>, vector<8x64xf32> -> vector<8x64xf32>
    %85 = arith.addf %79, %84 : vector<8x64xf32>
    %c1_64 = arith.constant 1 : index
    %c0_65 = arith.constant 0 : index
    %c0_66 = arith.constant 0 : index
    %86 = vector.load %arg14[%c1_64, %c0_65, %c0_66] : memref<2x1x64xf32, #tpu.memory_space<vmem>>, vector<1x1x64xf32>
    %87 = vector.shape_cast %86 : vector<1x1x64xf32> to vector<1x64xf32>
    %88 = vector.broadcast %87 : vector<1x64xf32> to vector<8x64xf32>
    %89 = arith.addf %85, %88 : vector<8x64xf32>
    %90 = vector.extract_strided_slice %89 {offsets = [0, 0], sizes = [8, 32], strides = [1, 1]} : vector<8x64xf32> to vector<8x32xf32>
    %91 = vector.extract_strided_slice %89 {offsets = [0, 32], sizes = [8, 32], strides = [1, 1]} : vector<8x64xf32> to vector<8x32xf32>
    %92 = vector.extract_strided_slice %3 {offsets = [1, 0], sizes = [1, 32], strides = [1, 1]} : vector<2x32xf32> to vector<1x32xf32>
    %93 = vector.broadcast %92 : vector<1x32xf32> to vector<8x32xf32>
    %94 = arith.addf %90, %93 : vector<8x32xf32>
    %95 = arith.negf %91 : vector<8x32xf32>
    %96 = math.exp %95 : vector<8x32xf32>
    %cst_67 = arith.constant 1.000000e+00 : f32
    %97 = vector.broadcast %cst_67 : f32 to vector<8x32xf32>
    %98 = arith.addf %97, %96 : vector<8x32xf32>
    %99 = arith.divf %97, %98 : vector<8x32xf32>
    %100 = arith.mulf %94, %99 : vector<8x32xf32>
    %101 = arith.addf %100, %67 : vector<8x32xf32>
    %cst_68 = arith.constant 0.707106769 : f32
    %102 = vector.broadcast %cst_68 : f32 to vector<8x32xf32>
    %103 = arith.mulf %101, %102 : vector<8x32xf32>
    %104 = arith.index_cast %arg0 : i32 to index
    %c0_69 = arith.constant 0 : index
    %105 = memref.load %arg6[%104, %c0_69] : memref<2x2xf32, #tpu.memory_space<smem>>
    %106 = arith.index_cast %arg0 : i32 to index
    %c1_70 = arith.constant 1 : index
    %107 = memref.load %arg6[%106, %c1_70] : memref<2x2xf32, #tpu.memory_space<smem>>
    %c0_71 = arith.constant 0 : index
    %c0_72 = arith.constant 0 : index
    %108 = vector.load %arg9[%c0_71, %c0_72] : memref<1x32xf32, #tpu.memory_space<vmem>>, vector<1x32xf32>
    %c0_73 = arith.constant 0 : index
    %c0_74 = arith.constant 0 : index
    %109 = vector.load %arg7[%c0_73, %c0_74] : memref<8x32xf32, #tpu.memory_space<vmem>>, vector<8x32xf32>
    %110 = vector.broadcast %105 : f32 to vector<8x32xf32>
    %111 = arith.mulf %110, %109 : vector<8x32xf32>
    %112 = vector.broadcast %108 : vector<1x32xf32> to vector<8x32xf32>
    %113 = arith.addf %111, %112 : vector<8x32xf32>
    %114 = math.sin %113 : vector<8x32xf32>
    %c0_75 = arith.constant 0 : index
    %c0_76 = arith.constant 0 : index
    %115 = vector.load %arg8[%c0_75, %c0_76] : memref<8x32xf32, #tpu.memory_space<vmem>>, vector<8x32xf32>
    %116 = vector.broadcast %107 : f32 to vector<8x32xf32>
    %117 = arith.mulf %116, %115 : vector<8x32xf32>
    %118 = vector.broadcast %108 : vector<1x32xf32> to vector<8x32xf32>
    %119 = arith.addf %117, %118 : vector<8x32xf32>
    %120 = math.sin %119 : vector<8x32xf32>
    %121 = arith.addf %103, %114 : vector<8x32xf32>
    %122 = arith.truncf %121 : vector<8x32xf32> to vector<8x32xbf16>
    %c0_77 = arith.constant 0 : index
    %c0_78 = arith.constant 0 : index
    %c0_79 = arith.constant 0 : index
    %123 = vector.load %arg2[%c0_77, %c0_78, %c0_79] : memref<1x8x32xf32, #tpu.memory_space<vmem>>, vector<1x8x32xf32>
    %124 = vector.shape_cast %123 : vector<1x8x32xf32> to vector<8x32xf32>
    %125 = arith.addf %124, %120 : vector<8x32xf32>
    %126 = arith.truncf %125 : vector<8x32xf32> to vector<8x32xbf16>
    %c0_80 = arith.constant 0 : index
    %c0_81 = arith.constant 0 : index
    %127 = vector.load %arg15[%c0_80, %c0_81] : memref<32x32xbf16, #tpu.memory_space<vmem>>, vector<32x32xbf16>
    %cst_82 = arith.constant dense<0.000000e+00> : vector<8x32xf32>
    %128 = tpu.matmul %122, %127, %cst_82 {dimension_numbers = #tpu.dot_dimension_numbers<[1], [0], [0], [1], [0, 0, 1, 1], [], []>} : vector<8x32xbf16>, vector<32x32xbf16>, vector<8x32xf32> -> vector<8x32xf32>
    %c0_83 = arith.constant 0 : index
    %c0_84 = arith.constant 0 : index
    %129 = vector.load %arg16[%c0_83, %c0_84] : memref<1x32xf32, #tpu.memory_space<vmem>>, vector<1x32xf32>
    %130 = vector.broadcast %129 : vector<1x32xf32> to vector<8x32xf32>
    %131 = arith.addf %128, %130 : vector<8x32xf32>
    %c0_85 = arith.constant 0 : index
    %c0_86 = arith.constant 0 : index
    %132 = vector.load %arg17[%c0_85, %c0_86] : memref<32x32xbf16, #tpu.memory_space<vmem>>, vector<32x32xbf16>
    %cst_87 = arith.constant dense<0.000000e+00> : vector<8x32xf32>
    %133 = tpu.matmul %126, %132, %cst_87 {dimension_numbers = #tpu.dot_dimension_numbers<[1], [0], [0], [1], [0, 0, 1, 1], [], []>} : vector<8x32xbf16>, vector<32x32xbf16>, vector<8x32xf32> -> vector<8x32xf32>
    %c0_88 = arith.constant 0 : index
    %c0_89 = arith.constant 0 : index
    %134 = vector.load %arg18[%c0_88, %c0_89] : memref<1x32xf32, #tpu.memory_space<vmem>>, vector<1x32xf32>
    %135 = vector.broadcast %134 : vector<1x32xf32> to vector<8x32xf32>
    %136 = arith.addf %133, %135 : vector<8x32xf32>
    %c0_90 = arith.constant 0 : index
    %c0_91 = arith.constant 0 : index
    %c0_92 = arith.constant 0 : index
    %137 = vector.load %arg3[%c0_90, %c0_91, %c0_92] : memref<1x8x32xf32, #tpu.memory_space<vmem>>, vector<1x8x32xf32>
    %138 = vector.shape_cast %137 : vector<1x8x32xf32> to vector<8x32xf32>
    %139 = arith.truncf %138 : vector<8x32xf32> to vector<8x32xbf16>
    %c0_93 = arith.constant 0 : index
    %c0_94 = arith.constant 0 : index
    %140 = vector.load %arg19[%c0_93, %c0_94] : memref<32x32xbf16, #tpu.memory_space<vmem>>, vector<32x32xbf16>
    %cst_95 = arith.constant dense<0.000000e+00> : vector<8x32xf32>
    %141 = tpu.matmul %139, %140, %cst_95 {dimension_numbers = #tpu.dot_dimension_numbers<[1], [0], [0], [1], [0, 0, 1, 1], [], []>} : vector<8x32xbf16>, vector<32x32xbf16>, vector<8x32xf32> -> vector<8x32xf32>
    %c0_96 = arith.constant 0 : index
    %c0_97 = arith.constant 0 : index
    %142 = vector.load %arg20[%c0_96, %c0_97] : memref<1x32xf32, #tpu.memory_space<vmem>>, vector<1x32xf32>
    %143 = vector.broadcast %142 : vector<1x32xf32> to vector<8x32xf32>
    %144 = arith.addf %141, %143 : vector<8x32xf32>
    %145 = arith.truncf %131 : vector<8x32xf32> to vector<8x32xbf16>
    %146 = arith.truncf %136 : vector<8x32xf32> to vector<8x32xbf16>
    %cst_98 = arith.constant dense<0.000000e+00> : vector<8x8xf32>
    %147 = tpu.matmul %145, %146, %cst_98 {dimension_numbers = #tpu.dot_dimension_numbers<[1], [1], [0], [0], [0, 0, 1, 0], [], []>} : vector<8x32xbf16>, vector<8x32xbf16>, vector<8x8xf32> -> vector<8x8xf32>
    %cst_99 = arith.constant 0.176776692 : f32
    %148 = vector.broadcast %cst_99 : f32 to vector<8x8xf32>
    %149 = arith.mulf %147, %148 : vector<8x8xf32>
    %cst_100 = arith.constant dense<0xFF800000> : vector<8xf32>
    %150 = vector.multi_reduction <maximumf>, %149, %cst_100 [1] : vector<8x8xf32> to vector<8xf32>
    %151 = vector.shape_cast %150 : vector<8xf32> to vector<8x1xf32>
    %152 = vector.broadcast %151 : vector<8x1xf32> to vector<8x8xf32>
    %153 = arith.subf %149, %152 : vector<8x8xf32>
    %154 = math.exp %153 : vector<8x8xf32>
    %cst_101 = arith.constant dense<0.000000e+00> : vector<8xf32>
    %155 = vector.multi_reduction <add>, %154, %cst_101 [1] : vector<8x8xf32> to vector<8xf32>
    %156 = vector.shape_cast %155 : vector<8xf32> to vector<8x1xf32>
    %157 = tpu.reciprocal %156 {approx = true} : vector<8x1xf32> -> vector<8x1xf32>
    %158 = vector.broadcast %157 : vector<8x1xf32> to vector<8x8xf32>
    %159 = arith.mulf %154, %158 : vector<8x8xf32>
    %160 = arith.truncf %159 : vector<8x8xf32> to vector<8x8xbf16>
    %161 = arith.truncf %144 : vector<8x32xf32> to vector<8x32xbf16>
    %cst_102 = arith.constant dense<0.000000e+00> : vector<8x32xf32>
    %162 = tpu.matmul %160, %161, %cst_102 {dimension_numbers = #tpu.dot_dimension_numbers<[1], [0], [0], [1], [0, 0, 1, 1], [], []>} : vector<8x8xbf16>, vector<8x32xbf16>, vector<8x32xf32> -> vector<8x32xf32>
    %cst_103 = arith.constant 0.176776692 : f32
    %163 = vector.broadcast %cst_103 : f32 to vector<8x32xf32>
    %164 = arith.mulf %162, %163 : vector<8x32xf32>
    %165 = arith.truncf %164 : vector<8x32xf32> to vector<8x32xbf16>
    %c0_104 = arith.constant 0 : index
    %c0_105 = arith.constant 0 : index
    %166 = vector.load %arg21[%c0_104, %c0_105] : memref<32x32xbf16, #tpu.memory_space<vmem>>, vector<32x32xbf16>
    %cst_106 = arith.constant dense<0.000000e+00> : vector<8x32xf32>
    %167 = tpu.matmul %165, %166, %cst_106 {dimension_numbers = #tpu.dot_dimension_numbers<[1], [0], [0], [1], [0, 0, 1, 1], [], []>} : vector<8x32xbf16>, vector<32x32xbf16>, vector<8x32xf32> -> vector<8x32xf32>
    %c0_107 = arith.constant 0 : index
    %c0_108 = arith.constant 0 : index
    %168 = vector.load %arg22[%c0_107, %c0_108] : memref<1x32xf32, #tpu.memory_space<vmem>>, vector<1x32xf32>
    %169 = vector.broadcast %168 : vector<1x32xf32> to vector<8x32xf32>
    %170 = arith.addf %167, %169 : vector<8x32xf32>
    %171 = arith.addf %170, %103 : vector<8x32xf32>
    %cst_109 = arith.constant 0.707106769 : f32
    %172 = vector.broadcast %cst_109 : f32 to vector<8x32xf32>
    %173 = arith.mulf %172, %171 : vector<8x32xf32>
    %c0_110 = arith.constant 0 : index
    %c0_111 = arith.constant 0 : index
    %c0_112 = arith.constant 0 : index
    %174 = vector.load %arg25[%c0_110, %c0_111, %c0_112] : memref<1x8x32xf32, #tpu.memory_space<vmem>>, vector<1x8x32xf32>
    %175 = vector.shape_cast %174 : vector<1x8x32xf32> to vector<8x32xf32>
    %176 = vector.shape_cast %173 : vector<8x32xf32> to vector<1x8x32xf32>
    tpu.vector_store %arg25[%c0_110, %c0_111, %c0_112], %176 {strides = array<i32>} : memref<1x8x32xf32, #tpu.memory_space<vmem>>, vector<1x8x32xf32>,
    %177 = arith.truncf %173 : vector<8x32xf32> to vector<8x32xbf16>
    %c0_113 = arith.constant 0 : index
    %c0_114 = arith.constant 0 : index
    %178 = vector.load %arg23[%c0_113, %c0_114] : memref<32x128xbf16, #tpu.memory_space<vmem>>, vector<32x128xbf16>
    %cst_115 = arith.constant dense<0.000000e+00> : vector<8x128xf32>
    %179 = tpu.matmul %177, %178, %cst_115 {dimension_numbers = #tpu.dot_dimension_numbers<[1], [0], [0], [1], [0, 0, 1, 1], [], []>} : vector<8x32xbf16>, vector<32x128xbf16>, vector<8x128xf32> -> vector<8x128xf32>
    %c0_116 = arith.constant 0 : index
    %c0_117 = arith.constant 0 : index
    %180 = vector.load %arg24[%c0_116, %c0_117] : memref<1x128xf32, #tpu.memory_space<vmem>>, vector<1x128xf32>
    %181 = vector.broadcast %180 : vector<1x128xf32> to vector<8x128xf32>
    %182 = arith.addf %179, %181 : vector<8x128xf32>
    %183 = vector.extract_strided_slice %182 {offsets = [0, 8], sizes = [8, 1], strides = [1, 1]} : vector<8x128xf32> to vector<8x1xf32>
    %184 = arith.negf %183 : vector<8x1xf32>
    %185 = math.exp %184 : vector<8x1xf32>
    %cst_118 = arith.constant 1.000000e+00 : f32
    %186 = vector.broadcast %cst_118 : f32 to vector<8x1xf32>
    %187 = arith.addf %186, %185 : vector<8x1xf32>
    %188 = arith.divf %186, %187 : vector<8x1xf32>
    %189 = tpu.iota {dimensions = array<i32: 1>} : vector<8x128xi32>
    %c8_i32 = arith.constant 8 : i32
    %190 = vector.broadcast %c8_i32 : i32 to vector<8x128xi32>
    %191 = arith.cmpi eq, %189, %190 : vector<8x128xi32>
    %192 = vector.shape_cast %188 : vector<8x1xf32> to vector<8x1xf32>
    %193 = vector.broadcast %192 : vector<8x1xf32> to vector<8x128xf32>
    %194 = arith.select %191, %193, %182 : vector<8x128xi1>, vector<8x128xf32>
    %c0_119 = arith.constant 0 : index
    %c0_120 = arith.constant 0 : index
    %c0_121 = arith.constant 0 : index
    %195 = vector.load %arg26[%c0_119, %c0_120, %c0_121] : memref<1x8x128xf32, #tpu.memory_space<vmem>>, vector<1x8x128xf32>
    %196 = vector.shape_cast %195 : vector<1x8x128xf32> to vector<8x128xf32>
    %197 = vector.shape_cast %194 : vector<8x128xf32> to vector<1x8x128xf32>
    tpu.vector_store %arg26[%c0_119, %c0_120, %c0_121], %197 {strides = array<i32>} : memref<1x8x128xf32, #tpu.memory_space<vmem>>, vector<1x8x128xf32>,
    return
  }
  func.func @transform_0(%arg0: i32) -> (i32, i32, i32) {
    %c0_i32 = arith.constant 0 : i32
    %c0_i32_0 = arith.constant 0 : i32
    %c0_i32_1 = arith.constant 0 : i32
    return %arg0, %c0_i32, %c0_i32_0 : i32, i32, i32
  }
  func.func @transform_1(%arg0: i32) -> (i32, i32, i32) {
    %c0_i32 = arith.constant 0 : i32
    %c0_i32_0 = arith.constant 0 : i32
    %c0_i32_1 = arith.constant 0 : i32
    return %arg0, %c0_i32, %c0_i32_0 : i32, i32, i32
  }
  func.func @transform_2(%arg0: i32) -> (i32, i32, i32) {
    %c0_i32 = arith.constant 0 : i32
    %c0_i32_0 = arith.constant 0 : i32
    %c0_i32_1 = arith.constant 0 : i32
    return %arg0, %c0_i32, %c0_i32_0 : i32, i32, i32
  }
  func.func @transform_3(%arg0: i32) -> (i32, i32, i32) {
    %c0_i32 = arith.constant 0 : i32
    %c0_i32_0 = arith.constant 0 : i32
    %c0_i32_1 = arith.constant 0 : i32
    return %arg0, %c0_i32, %c0_i32_0 : i32, i32, i32
  }
  func.func @transform_4(%arg0: i32) -> (i32, i32, i32) {
    %c0_i32 = arith.constant 0 : i32
    %c0_i32_0 = arith.constant 0 : i32
    %c0_i32_1 = arith.constant 0 : i32
    return %arg0, %c0_i32, %c0_i32_0 : i32, i32, i32
  }
  func.func @transform_5(%arg0: i32) -> (i32, i32) {
    %c0_i32 = arith.constant 0 : i32
    %c0_i32_0 = arith.constant 0 : i32
    %c0_i32_1 = arith.constant 0 : i32
    return %c0_i32, %c0_i32_0 : i32, i32
  }
  func.func @transform_6(%arg0: i32) -> (i32, i32) {
    %c0_i32 = arith.constant 0 : i32
    %c0_i32_0 = arith.constant 0 : i32
    %c0_i32_1 = arith.constant 0 : i32
    return %c0_i32, %c0_i32_0 : i32, i32
  }
  func.func @transform_7(%arg0: i32) -> (i32, i32) {
    %c0_i32 = arith.constant 0 : i32
    %c0_i32_0 = arith.constant 0 : i32
    %c0_i32_1 = arith.constant 0 : i32
    return %c0_i32, %c0_i32_0 : i32, i32
  }
  func.func @transform_8(%arg0: i32) -> (i32, i32) {
    %c0_i32 = arith.constant 0 : i32
    %c0_i32_0 = arith.constant 0 : i32
    %c0_i32_1 = arith.constant 0 : i32
    return %c0_i32, %c0_i32_0 : i32, i32
  }
  func.func @transform_9(%arg0: i32) -> (i32, i32) {
    %c0_i32 = arith.constant 0 : i32
    %c0_i32_0 = arith.constant 0 : i32
    %c0_i32_1 = arith.constant 0 : i32
    return %c0_i32, %c0_i32_0 : i32, i32
  }
  func.func @transform_10(%arg0: i32) -> (i32, i32) {
    %c0_i32 = arith.constant 0 : i32
    %c0_i32_0 = arith.constant 0 : i32
    %c0_i32_1 = arith.constant 0 : i32
    return %c0_i32, %c0_i32_0 : i32, i32
  }
  func.func @transform_11(%arg0: i32) -> (i32, i32, i32) {
    %c0_i32 = arith.constant 0 : i32
    %c0_i32_0 = arith.constant 0 : i32
    %c0_i32_1 = arith.constant 0 : i32
    %c0_i32_2 = arith.constant 0 : i32
    return %c0_i32, %c0_i32_0, %c0_i32_1 : i32, i32, i32
  }
  func.func @transform_12(%arg0: i32) -> (i32, i32, i32) {
    %c0_i32 = arith.constant 0 : i32
    %c0_i32_0 = arith.constant 0 : i32
    %c0_i32_1 = arith.constant 0 : i32
    %c0_i32_2 = arith.constant 0 : i32
    return %c0_i32, %c0_i32_0, %c0_i32_1 : i32, i32, i32
  }
  func.func @transform_13(%arg0: i32) -> (i32, i32, i32) {
    %c0_i32 = arith.constant 0 : i32
    %c0_i32_0 = arith.constant 0 : i32
    %c0_i32_1 = arith.constant 0 : i32
    %c0_i32_2 = arith.constant 0 : i32
    return %c0_i32, %c0_i32_0, %c0_i32_1 : i32, i32, i32
  }
  func.func @transform_14(%arg0: i32) -> (i32, i32) {
    %c0_i32 = arith.constant 0 : i32
    %c0_i32_0 = arith.constant 0 : i32
    %c0_i32_1 = arith.constant 0 : i32
    return %c0_i32, %c0_i32_0 : i32, i32
  }
  func.func @transform_15(%arg0: i32) -> (i32, i32) {
    %c0_i32 = arith.constant 0 : i32
    %c0_i32_0 = arith.constant 0 : i32
    %c0_i32_1 = arith.constant 0 : i32
    return %c0_i32, %c0_i32_0 : i32, i32
  }
  func.func @transform_16(%arg0: i32) -> (i32, i32) {
    %c0_i32 = arith.constant 0 : i32
    %c0_i32_0 = arith.constant 0 : i32
    %c0_i32_1 = arith.constant 0 : i32
    return %c0_i32, %c0_i32_0 : i32, i32
  }
  func.func @transform_17(%arg0: i32) -> (i32, i32) {
    %c0_i32 = arith.constant 0 : i32
    %c0_i32_0 = arith.constant 0 : i32
    %c0_i32_1 = arith.constant 0 : i32
    return %c0_i32, %c0_i32_0 : i32, i32
  }
  func.func @transform_18(%arg0: i32) -> (i32, i32) {
    %c0_i32 = arith.constant 0 : i32
    %c0_i32_0 = arith.constant 0 : i32
    %c0_i32_1 = arith.constant 0 : i32
    return %c0_i32, %c0_i32_0 : i32, i32
  }
  func.func @transform_19(%arg0: i32) -> (i32, i32) {
    %c0_i32 = arith.constant 0 : i32
    %c0_i32_0 = arith.constant 0 : i32
    %c0_i32_1 = arith.constant 0 : i32
    return %c0_i32, %c0_i32_0 : i32, i32
  }
  func.func @transform_20(%arg0: i32) -> (i32, i32) {
    %c0_i32 = arith.constant 0 : i32
    %c0_i32_0 = arith.constant 0 : i32
    %c0_i32_1 = arith.constant 0 : i32
    return %c0_i32, %c0_i32_0 : i32, i32
  }
  func.func @transform_21(%arg0: i32) -> (i32, i32) {
    %c0_i32 = arith.constant 0 : i32
    %c0_i32_0 = arith.constant 0 : i32
    %c0_i32_1 = arith.constant 0 : i32
    return %c0_i32, %c0_i32_0 : i32, i32
  }
  func.func @transform_22(%arg0: i32) -> (i32, i32) {
    %c0_i32 = arith.constant 0 : i32
    %c0_i32_0 = arith.constant 0 : i32
    %c0_i32_1 = arith.constant 0 : i32
    return %c0_i32, %c0_i32_0 : i32, i32
  }
  func.func @transform_23(%arg0: i32) -> (i32, i32) {
    %c0_i32 = arith.constant 0 : i32
    %c0_i32_0 = arith.constant 0 : i32
    %c0_i32_1 = arith.constant 0 : i32
    return %c0_i32, %c0_i32_0 : i32, i32
  }
  func.func @transform_24(%arg0: i32) -> (i32, i32, i32) {
    %c0_i32 = arith.constant 0 : i32
    %c0_i32_0 = arith.constant 0 : i32
    %c0_i32_1 = arith.constant 0 : i32
    return %arg0, %c0_i32, %c0_i32_0 : i32, i32, i32
  }
  func.func @transform_25(%arg0: i32) -> (i32, i32, i32) {
    %c0_i32 = arith.constant 0 : i32
    %c0_i32_0 = arith.constant 0 : i32
    %c0_i32_1 = arith.constant 0 : i32
    return %arg0, %c0_i32, %c0_i32_0 : i32, i32, i32
  }
}

</mosaic_0001>

<bundles_post_ra>
// kernel: tpu_custom_call.1
= control target key start
LH: loop header
LB: loop body
LE: loop exit
PB: predicated region body
PF: predicated region fallthrough
CT: control target
= control target key end

     0   :  { %s4520_s0 = inlined_call_operand.vmem [shape: f32[2,8,4], index: 0, kind: input, shape index: {}]   ;;  %s4521_s1 = inlined_call_operand.vmem [shape: f32[2,8,32], index: 1, kind: input, shape index: {}]   ;;  %s4522_s2 = inlined_call_operand.hbm [shape: f32[2,8,32], index: 2, kind: input, shape index: {}]   ;;  %s4523_s3 = inlined_call_operand.hbm [shape: f32[2,2,32], index: 3, kind: input, shape index: {}]   ;;  %s4524_s4 = inlined_call_operand.hbm [shape: f32[2,2,32], index: 4, kind: input, shape index: {}]   ;;  %s4525_s5 = inlined_call_operand.hbm [shape: f32[2,2], index: 5, kind: input, shape index: {}]   ;;  %s4526_s6 = inlined_call_operand.hbm [shape: f32[8,32], index: 6, kind: input, shape index: {}]   ;;  %s4527_s7 = inlined_call_operand.hbm [shape: f32[8,32], index: 7, kind: input, shape index: {}]   ;;  %s4528_s8 = inlined_call_operand.hbm [shape: f32[1,32], index: 8, kind: input, shape index: {}]   ;;  %s4529_s9 = inlined_call_operand.hbm [shape: bf16[4,32], index: 9, kind: input, shape index: {}]   ;;  %s4530_s10 = inlined_call_operand.vmem [shape: bf16[32,32], index: 10, kind: input, shape index: {}]   ;;  %s4531_s11 = inlined_call_operand.hbm [shape: f32[2,1,32], index: 11, kind: input, shape index: {}]   ;;  %s4532_s12 = inlined_call_operand.hbm [shape: bf16[6,32,64], index: 12, kind: input, shape index: {}]   ;;  %s4533_s13 = inlined_call_operand.hbm [shape: f32[2,1,64], index: 13, kind: input, shape index: {}]   ;;  %s4534_s14 = inlined_call_operand.vmem [shape: bf16[32,32], index: 14, kind: input, shape index: {}]   ;;  %s4535_s15 = inlined_call_operand.hbm [shape: f32[1,32], index: 15, kind: input, shape index: {}]   ;;  %s4536_s16 = inlined_call_operand.vmem [shape: bf16[32,32], index: 16, kind: input, shape index: {}]   ;;  %s4537_s17 = inlined_call_operand.vmem [shape: f32[1,32], index: 17, kind: input, shape index: {}]   ;;  %s4538_s18 = inlined_call_operand.vmem [shape: bf16[32,32], index: 18, kind: input, shape index: {}]   ;;  %s4539_s19 = inlined_call_operand.vmem [shape: f32[1,32], index: 19, kind: input, shape index: {}]   ;;  %s4540_s20 = inlined_call_operand.vmem [shape: bf16[32,32], index: 20, kind: input, shape index: {}]   ;;  %s4541_s21 = inlined_call_operand.vmem [shape: f32[1,32], index: 21, kind: input, shape index: {}]   ;;  %s4542_s22 = inlined_call_operand.hbm [shape: bf16[32,128], index: 22, kind: input, shape index: {}]   ;;  %s4543_s23 = inlined_call_operand.vmem [shape: f32[1,128], index: 23, kind: input, shape index: {}]   ;;  %s4544_s24 = inlined_call_operand.hbm [shape: f32[2,8,32], index: 24, kind: output, shape index: {0}]   ;;  %s4545_s25 = inlined_call_operand.hbm [shape: f32[2,8,128], index: 25, kind: output, shape index: {1}]  }
   0x1   :  { %4587 = sst [smem:[#allocation44_spill]] %s4520_s0 }
   0x2   :  { %4588 = sst [smem:[#allocation45_spill]] %s4521_s1 }
   0x3   :  { %4589 = sst [smem:[#allocation46_spill]] %s4522_s2 }
   0x4   :  { %4590 = sst [smem:[#allocation47_spill]] %s4523_s3 }
   0x5   :  { %4591 = sst [smem:[#allocation48_spill]] %s4524_s4 }
   0x6   :  { %4592 = sst [smem:[#allocation49_spill]] %s4525_s5 }
   0x7   :  { %4593 = sst [smem:[#allocation50_spill]] %s4526_s6 }
   0x8   :  { %4594 = sst [smem:[#allocation51_spill]] %s4527_s7 }
   0x9   :  { %4595 = sst [smem:[#allocation52_spill]] %s4528_s8 }
   0xa   :  { %4596 = sst [smem:[#allocation53_spill]] %s4529_s9 }
   0xb   :  { %4597 = sst [smem:[#allocation54_spill]] %s4530_s10 }
   0xc   :  { %4598 = sst [smem:[#allocation55_spill]] %s4531_s11 }
   0xd   :  { %4599 = sst [smem:[#allocation56_spill]] %s4533_s13 }
   0xe   :  { %4600 = sst [smem:[#allocation57_spill]] %s4534_s14 }
   0xf   :  { %4601 = sst [smem:[#allocation58_spill]] %s4536_s16 }
  0x10   :  { %4602 = sst [smem:[#allocation59_spill]] %s4537_s17 }
  0x11   :  { %4603 = sst [smem:[#allocation60_spill]] %s4538_s18 }
  0x12   :  { %4604 = sst [smem:[#allocation61_spill]] %s4539_s19 }
  0x13   :  { %4605 = sst [smem:[#allocation62_spill]] %s4540_s20 }
  0x14   :  { %4606 = sst [smem:[#allocation63_spill]] %s4541_s21 }
  0x15   :  { %4607 = sst [smem:[#allocation64_spill]] %s4543_s23 }
  0x16   :  { %4608 = sst [smem:[#allocation65_spill]] %s4544_s24 }
  0x17   :  { %4609 = sst [smem:[#allocation66_spill]] %s4545_s25 }
  0x18   :  { %31 = vsyncpa [#allocation4], 0 }
  0x19   :  { %33 = vsyncpa [#allocation4 + $0x1], 0 }
  0x1a   :  { %34 = vsyncpa [#allocation8], 0 }
  0x1b   :  { %36 = vsyncpa [#allocation8 + $0x1], 0 }
  0x1c   :  { %37 = vsyncpa [#allocation6], 0 }
  0x1d   :  { %38 = vsyncpa [#allocation12], 0 }
  0x1e   :  { %39 = vsyncpa [#allocation15], 0 }
  0x1f   :  { %40 = vsyncpa [#allocation18], 0 }
  0x20   :  { %41 = vsyncpa [#allocation21], 0 }
  0x21   :  { %42 = vsyncpa [#allocation24], 0 }
  0x22   :  { %43 = vsyncpa [#allocation5], 0 }
  0x23   :  { %45 = vsyncpa [#allocation5 + $0x1], 0 }
  0x24   :  { %46 = vsyncpa [#allocation27], 0 }
  0x25   :  { %48 = vsyncpa [#allocation27 + $0x1], 0  ;;  %s3731_s29 = smov 0   ;;  %s3733_s2 = smov 0  }
  0x26   :  { %s3735_s6 = smov 0   ;;  %s3737_s30 = smov 0  }
  0x27 LB: > { %4610 = sst [smem:[#allocation38_spill]] %s3558_s29  ;;  %s3572_s7 = smov [#allocation11]   ;;  %s3570_s30 = sphi %s3737_s30, %s4678_s30   ;;  %s3566_s6 = sphi %s3735_s6, %s4680_s6   ;;  %s3562_s2 = sphi %s3733_s2, %s4682_s2   ;;  %s3558_s29 = sphi %s3731_s29, %s4681_s29  }
  0x28   : > { %4611 = sst [smem:[#allocation39_spill]] %s3566_s6  ;;  %s662_s3 = sshll.u32 %s3572_s7, 4  ;;  %s663_s3 = int_to_ptr.vmem [resolvable:$true] %s662_s3 }
  0x29   : > { %s3752_s26 = sadd.s32 4294967295, %s3570_s30   ;;  %p2597_p0 = scmp.ge.s32.totalorder %s3570_s30, 1 }
  0x2a   : > { %p4556_p1 = scmp.eq.s32.totalorder %s3752_s26, 0  ;;  %p640_p2 = scmp.lt.s32.totalorder %s3570_s30, 3 }
  0x2b   : > { %s3573_s8 = smov [#allocation14]   ;;  %s3574_s4 = smov [#allocation17]  }
  0x2c   : > { %p3757_p3 = pnand %p2597_p0, %p640_p2  ;;  %s684_s27 = sshll.u32 %s3573_s8, 4  ;;  %s3764_s27 = int_to_ptr.vmem [resolvable:$true] %s684_s27 }
  0x2d   : > { %s708_s28 = sshll.u32 %s3574_s4, 4  ;;  %s4614_s7 = sld [smem:[#allocation50_spill]]  ;;  %s3772_s28 = int_to_ptr.vmem [resolvable:$true] %s708_s28 }
  0x2e   : > { %s4612_s1 = scalar_select %p3757_p3, 1, 0 }
  0x2f   : > { %p2914_p5 = pneg %p3757_p3 }
  0x31   : > { %p3768_p6 = pnand %p2914_p5, %p4556_p1 }
  0x33   : > { %s4613_s9 = scalar_select %p3768_p6, 1, 0 }
  0x34   : > { %s3089_s25 = scalar_lea.hbm %s4614_s7, 128  ;;  %p3782_p8 = pneg %p3768_p6 }
  0x35   : > { %p3090_p7 = scmp.ne.s32.totalorder %s4614_s7, %s3089_s25  ;;  %p3096_p11 = scmp.lt.u32.totalorder %s3089_s25, %s4614_s7 }
  0x36   : > { %s4615_s8 = scalar_select %p3782_p8, 1, 0 }
  0x37   : > { %p3092_p9 = pnand %p3782_p8, %p3090_p7 }
  0x39   : > { %p3093_p10 = pneg %p3092_p9 }
  0x3b   : > { %p3098_p12 = pnand %p3096_p11, %p3093_p10 }
  0x3d   : > { %3101 = shalt.err (!%p3098_p12)
}
  0x3e   : > { %s3102_s5 = scalar_lea.vmem %s663_s3, 128  ;;  %p3110_p5 = scmp.lt.s32.totalorder %s663_s3, %s663_s3 }
  0x3f   : > { %p3103_p13 = scmp.ne.s32.totalorder %s663_s3, %s3102_s5  ;;  %p3111_p4 = scmp.lt.s32.totalorder %s3102_s5, %s3102_s5 }
  0x41   : > { %p3105_p0 = pnand %p3103_p13, %p3782_p8  ;;  %p3112_p1 = por %p3111_p4, %p3110_p5 }
  0x43   : > { %p3106_p2 = pneg %p3105_p0 }
  0x45   : > { %p3113_p3 = pnand %p3112_p1, %p3106_p2 }
  0x47   : > { %3116 = shalt.err (!%p3113_p3)
}
  0x48   : > { %2920 = dma.hbm_to_vmem [thread:$0]  (!%p3768_p6), %s4614_s7, 128, %s663_s3, [#allocation12]  }
  0x49   : > { %s4616_s0 = sld [smem:[#allocation52_spill]] }
  0x4f   : > { %s3117_s4 = scalar_lea.hbm %s4616_s0, 16 }
  0x50   : > { %p3118_p7 = scmp.ne.s32.totalorder %s4616_s0, %s3117_s4  ;;  %p3124_p1 = scmp.lt.u32.totalorder %s3117_s4, %s4616_s0 }
  0x52   : > { %p3120_p9 = pnand %p3118_p7, %p3782_p8 }
  0x54   : > { %p3121_p4 = pneg %p3120_p9 }
  0x56   : > { %p3126_p3 = pnand %p3124_p1, %p3121_p4 }
  0x58   : > { %3129 = shalt.err (!%p3126_p3)
}
  0x59   : > { %s3130_s3 = scalar_lea.vmem %s3764_s27, 16  ;;  %s3137_s19 = scalar_lea.vmem %s3764_s27, 32 }
  0x5a   : > { %p3131_p10 = scmp.ne.s32.totalorder %s3764_s27, %s3130_s3  ;;  %p3138_p13 = scmp.lt.s32.totalorder %s3764_s27, %s3764_s27 }
  0x5b   : > { %p3139_p0 = scmp.lt.s32.totalorder %s3137_s19, %s3130_s3 }
  0x5c   : > { %p3133_p11 = pnand %p3131_p10, %p3782_p8 }
  0x5d   : > { %p3140_p2 = por %p3139_p0, %p3138_p13 }
  0x5e   : > { %p3134_p12 = pneg %p3133_p11 }
  0x60   : > { %p3141_p5 = pnand %p3140_p2, %p3134_p12 }
  0x62   : > { %3144 = shalt.err (!%p3141_p5)
}
  0x63   : > { %2926 = dma.hbm_to_vmem [thread:$0]  (!%p3768_p6), %s4616_s0, 16, %s3764_s27, [#allocation15]  }
  0x64   : > { %s4617_s11 = sld [smem:[#allocation55_spill]] }
  0x6a   : > { %s3145_s21 = scalar_lea.hbm %s4617_s11, 32 }
  0x6b   : > { %p3146_p7 = scmp.ne.s32.totalorder %s4617_s11, %s3145_s21  ;;  %p3152_p1 = scmp.lt.u32.totalorder %s3145_s21, %s4617_s11 }
  0x6d   : > { %p3148_p9 = pnand %p3146_p7, %p3782_p8 }
  0x6f   : > { %p3149_p4 = pneg %p3148_p9 }
  0x71   : > { %p3154_p3 = pnand %p3152_p1, %p3149_p4 }
  0x73   : > { %3157 = shalt.err (!%p3154_p3)
}
  0x74   : > { %s3158_s27 = scalar_lea.vmem %s3772_s28, 32  ;;  %p3166_p13 = scmp.lt.s32.totalorder %s3772_s28, %s3772_s28 }
  0x75   : > { %p3159_p10 = scmp.ne.s32.totalorder %s3772_s28, %s3158_s27  ;;  %p3167_p0 = scmp.lt.s32.totalorder %s3158_s27, %s3158_s27 }
  0x77   : > { %p3161_p11 = pnand %p3159_p10, %p3782_p8  ;;  %p3168_p2 = por %p3167_p0, %p3166_p13 }
  0x79   : > { %p3162_p12 = pneg %p3161_p11 }
  0x7b   : > { %p3169_p5 = pnand %p3168_p2, %p3162_p12 }
  0x7d   : > { %3172 = shalt.err (!%p3169_p5)
}
  0x7e   : > { %s3575_s19 = smov 16   ;;  %s3576_s18 = smov 1  }
  0x7f   : > { %2932 = dma.hbm_to_vmem [thread:$0]  (!%p3768_p6), %s4617_s11, 32, %s3772_s28, [#allocation18], %s3575_s19, %s3575_s19, %s3576_s18  }
  0x80   : > { %s3577_s24 = smov [#allocation20]   ;;  %s4618_s13 = sld [smem:[#allocation56_spill]] }
  0x81   : > { %s734_s21 = sshll.u32 %s3577_s24, 4  ;;  %s735_s21 = int_to_ptr.vmem [resolvable:$true] %s734_s21 }
  0x86   : > { %s3173_s5 = scalar_lea.hbm %s4618_s13, 32 }
  0x87   : > { %p3174_p7 = scmp.ne.s32.totalorder %s4618_s13, %s3173_s5  ;;  %p3180_p1 = scmp.lt.u32.totalorder %s3173_s5, %s4618_s13 }
  0x89   : > { %p3176_p9 = pnand %p3174_p7, %p3782_p8 }
  0x8b   : > { %p3177_p4 = pneg %p3176_p9 }
  0x8d   : > { %p3182_p3 = pnand %p3180_p1, %p3177_p4 }
  0x8f   : > { %3185 = shalt.err (!%p3182_p3)
}
  0x90   : > { %s3186_s28 = scalar_lea.vmem %s735_s21, 32  ;;  %p3194_p13 = scmp.lt.s32.totalorder %s735_s21, %s735_s21 }
  0x91   : > { %p3187_p10 = scmp.ne.s32.totalorder %s735_s21, %s3186_s28  ;;  %p3195_p0 = scmp.lt.s32.totalorder %s3186_s28, %s3186_s28 }
  0x93   : > { %p3189_p11 = pnand %p3187_p10, %p3782_p8  ;;  %p3196_p2 = por %p3195_p0, %p3194_p13 }
  0x95   : > { %p3190_p12 = pneg %p3189_p11 }
  0x97   : > { %p3197_p5 = pnand %p3196_p2, %p3190_p12 }
  0x99   : > { %3200 = shalt.err (!%p3197_p5)
}
  0x9a   : > { %2938 = dma.hbm_to_vmem [thread:$0]  (!%p3768_p6), %s4618_s13, 32, %s735_s21, [#allocation21], %s3575_s19, %s3575_s19, %s3576_s18  }
  0x9b   : > { %s2596_s7 = sadd.s32 4294967294, %s3570_s30   ;;  %s3865_s0 = sadd.s32 1, %s3570_s30  }
  0x9c   : > { %4619 = sst [smem:[#allocation40_spill]] %s3865_s0  ;;  %s110_s24 = ssub.s32 %s3570_s30, %s3865_s0 }
  0x9d   : > { %s113_s25 = sadd.s32 1, %s3566_s6  ;;  %p111_p7 = scmp.eq.s32.totalorder %s110_s24, 0 }
  0x9e   : > { %p120_p9 = scmp.ne.s32.totalorder %s3566_s6, %s3562_s2  ;;  %p121_p4 = scmp.eq.s32.totalorder %s3570_s30, 0 }
  0x9f   : > { %p126_p1 = scmp.ne.s32.totalorder %s3562_s2, %s3558_s29  ;;  %p4621_p10 = scmp.eq.s32.totalorder %s3752_s26, 0 }
  0xa0   : > { %s3876_s4 = scalar_select %p111_p7, %s3566_s6, %s113_s25  }
  0xa1   : > { %p122_p3 = por %p121_p4, %p120_p9  ;;  %p3880_p11 = por %p4621_p10, %p126_p1 }
  0xa2   : > { %4620 = sst [smem:[#allocation41_spill]] %s3876_s4  ;;  %p601_p12 = scmp.eq.s32.totalorder %s3752_s26, 1 }
  0xa3   : > { %s4622_s5 = scalar_select %p3880_p11, 1, 0 }
  0xa4   : > { %p607_p13 = scmp.eq.s32.totalorder %s2596_s7, 1  ;;  %p2972_p0 = scmp.lt.s32.totalorder %s3570_s30, 2 }
  0xa5   : > { %s3887_s19 = sand.u32 1, %s3566_s6   ;;  %p3889_p2 = por %p601_p12, %p120_p9 }
  0xa6   : > { %p3893_p5 = por %p607_p13, %p126_p1  ;;  %p3897_p7 = pnand %p2972_p0, %p122_p3 }
  0xa7   : > { %s4623_s18 = scalar_select %p3889_p2, 1, 0 }
  0xa8   : > { %s4625_s21 = scalar_select %p3893_p5, 1, 0 }
  0xa9   : > { %4624 = sst [smem:[#allocation42_spill]] %s4623_s18  ;;  %s828_s27 = sand.u32 1, %s3570_s30  }
  0xaa   : > { %4626 = sst [smem:[#allocation43_spill]] %s4625_s21  ;;  %s4563_s28 = sshll.u32 %s3887_s19, 1 }
  0xab   : > { %s4627_s3 = scalar_select %p3897_p7, 1, 0 }
  0xac   : > { %s4564_s20 = sshll.u32 %s3570_s30, 5  ;;  %s832_s23 = scalar_lea.vmem [#allocation7], %s4563_s28 }
  0xad   : > { %s839_s7 = sshll.u32 %s832_s23, 4  ;;  %s4628_s11 = sld [smem:[#allocation47_spill]]  ;;  %s3913_s7 = int_to_ptr.vmem [resolvable:$true] %s839_s7 }
  0xae   : > { %s3915_s4 = scalar_lea.sflag [#allocation8], %s828_s27  ;;  %p3921_p4 = pneg %p3897_p7 }
  0xb0   : > { %s4629_s28 = scalar_select %p3921_p4, 1, 0 }
  0xb3   : > { %s3911_s13 = scalar_lea.hbm %s4628_s11, %s4564_s20  ;;  %s3206_s25 = scalar_lea.hbm %s4628_s11, 64 }
  0xb4   : > { %s3201_s6 = scalar_lea.hbm %s3911_s13, 32  ;;  %p3207_p10 = scmp.lt.u32.totalorder %s3911_s13, %s4628_s11 }
  0xb5   : > { %p3202_p9 = scmp.ne.s32.totalorder %s3911_s13, %s3201_s6  ;;  %p3208_p12 = scmp.lt.u32.totalorder %s3206_s25, %s3201_s6 }
  0xb6   : > { %p3210_p0 = scmp.lt.u32.totalorder %s3201_s6, %s3911_s13 }
  0xb7   : > { %p3204_p1 = pnand %p3921_p4, %p3202_p9  ;;  %p3209_p13 = por %p3208_p12, %p3207_p10 }
  0xb9   : > { %p3205_p3 = pneg %p3204_p1  ;;  %p3211_p5 = por %p3210_p0, %p3209_p13 }
  0xbb   : > { %p3212_p2 = pnand %p3211_p5, %p3205_p3 }
  0xbd   : > { %3215 = shalt.err (!%p3212_p2)
}
  0xbe   : > { %s3216_s27 = scalar_lea.vmem %s3913_s7, 32  ;;  %s3578_s23 = smov [#allocation7]  }
  0xbf   : > { %p3217_p9 = scmp.ne.s32.totalorder %s3913_s7, %s3216_s27  ;;  %s3221_s24 = sshll.u32 %s3578_s23, 4  ;;  %s3222_s24 = int_to_ptr.vmem [resolvable:$false] %s3221_s24 }
  0xc0   : > { %s3223_s0 = scalar_lea.vmem %s3222_s24, 64  ;;  %p3224_p6 = scmp.lt.s32.totalorder %s3913_s7, %s3222_s24 }
  0xc1   : > { %p3219_p1 = pnand %p3217_p9, %p3921_p4  ;;  %p3225_p8 = scmp.lt.s32.totalorder %s3223_s0, %s3216_s27 }
  0xc3   : > { %p3220_p11 = pneg %p3219_p1  ;;  %p3226_p10 = por %p3225_p8, %p3224_p6 }
  0xc5   : > { %p3227_p12 = pnand %p3226_p10, %p3220_p11 }
  0xc7   : > { %3230 = shalt.err (!%p3227_p12)
}
  0xc8   : > { %2951 = dma.hbm_to_vmem [thread:$0]  (!%p3897_p7), %s3911_s13, 32, %s3913_s7, %s3915_s4  }
  0xc9   : > { %s4630_s6 = sshll.u32 %s3570_s30, 5  ;;  %s4631_s11 = sld [smem:[#allocation48_spill]] }
  0xca   : > { %s4632_s27 = sld [smem:[#allocation49_spill]]  ;;  %p4633_p8 = scmp.ne.s32.totalorder %s4615_s8, 0 }
  0xcf   : > { %s3950_s23 = scalar_lea.hbm %s4631_s11, %s4630_s6 }
  0xd0   : > { %s3231_s0 = scalar_lea.hbm %s4632_s27, 32 }
  0xd1   : > { %p3232_p6 = scmp.ne.s32.totalorder %s4632_s27, %s3231_s0  ;;  %p3238_p5 = scmp.lt.u32.totalorder %s3231_s0, %s4632_s27 }
  0xd3   : > { %p3234_p11 = pnand %p3232_p6, %p4633_p8 }
  0xd5   : > { %p3235_p2 = pneg %p3234_p11 }
  0xd7   : > { %p3240_p3 = pnand %p3238_p5, %p3235_p2 }
  0xd9   : > { %3243 = shalt.err (!%p3240_p3)
}
  0xda   : > { %s3579_s13 = smov [#allocation10]   ;;  %p4634_p13 = scmp.ne.s32.totalorder %s4613_s9, 0 }
  0xdb   : > { %s3580_s21 = smov [#allocation13]   ;;  %s3581_s18 = smov [#allocation16]  }
  0xdc   : > { %2917 = dma.hbm_to_smem (!%p4634_p13), %s4632_s27, 32, %s3579_s13, [#allocation6]  }
  0xdd   : > { %s673_s29 = sshll.u32 %s3580_s21, 4  ;;  %s695_s20 = sshll.u32 %s3581_s18, 4  ;;  %s674_s29 = int_to_ptr.vmem [resolvable:$true] %s673_s29  ;;  %s696_s20 = int_to_ptr.vmem [resolvable:$true] %s695_s20 }
  0xde   : > { %s4635_s16 = sld [smem:[#allocation51_spill]] }
  0xe4   : > { %s3244_s14 = scalar_lea.hbm %s4635_s16, 128 }
  0xe5   : > { %p3245_p0 = scmp.ne.s32.totalorder %s4635_s16, %s3244_s14  ;;  %p3251_p10 = scmp.lt.u32.totalorder %s3244_s14, %s4635_s16 }
  0xe7   : > { %p3247_p9 = pnand %p3245_p0, %p4633_p8 }
  0xe9   : > { %p3248_p1 = pneg %p3247_p9 }
  0xeb   : > { %p3253_p12 = pnand %p3251_p10, %p3248_p1 }
  0xed   : > { %3256 = shalt.err (!%p3253_p12)
}
  0xee   : > { %s3257_s13 = scalar_lea.vmem %s674_s29, 128  ;;  %p3265_p5 = scmp.lt.s32.totalorder %s674_s29, %s674_s29 }
  0xef   : > { %p3258_p6 = scmp.ne.s32.totalorder %s674_s29, %s3257_s13  ;;  %p3266_p3 = scmp.lt.s32.totalorder %s3257_s13, %s3257_s13 }
  0xf1   : > { %p3260_p11 = pnand %p3258_p6, %p4633_p8  ;;  %p3267_p7 = por %p3266_p3, %p3265_p5 }
  0xf3   : > { %p3261_p2 = pneg %p3260_p11 }
  0xf5   : > { %p3268_p4 = pnand %p3267_p7, %p3261_p2 }
  0xf7   : > { %3271 = shalt.err (!%p3268_p4)
}
  0xf8   : > { %2923 = dma.hbm_to_vmem [thread:$0]  (!%p4634_p13), %s4635_s16, 128, %s674_s29, [#allocation12]  }
  0xf9   : > { %s4636_s25 = sld [smem:[#allocation53_spill]] }
  0xff   : > { %s3272_s24 = scalar_lea.hbm %s4636_s25, 32 }
 0x100   : > { %p3273_p0 = scmp.ne.s32.totalorder %s4636_s25, %s3272_s24  ;;  %p3279_p4 = scmp.lt.u32.totalorder %s3272_s24, %s4636_s25 }
 0x102   : > { %p3275_p9 = pnand %p3273_p0, %p4633_p8 }
 0x104   : > { %p3276_p7 = pneg %p3275_p9 }
 0x106   : > { %p3281_p1 = pnand %p3279_p4, %p3276_p7 }
 0x108   : > { %3284 = shalt.err (!%p3281_p1)
}
 0x109   : > { %s3285_s13 = scalar_lea.vmem %s696_s20, 32  ;;  %p3293_p11 = scmp.lt.s32.totalorder %s696_s20, %s696_s20 }
 0x10a   : > { %p3286_p10 = scmp.ne.s32.totalorder %s696_s20, %s3285_s13  ;;  %p3294_p2 = scmp.lt.s32.totalorder %s3285_s13, %s3285_s13 }
 0x10c   : > { %p3288_p12 = pnand %p3286_p10, %p4633_p8  ;;  %p3295_p5 = por %p3294_p2, %p3293_p11 }
 0x10e   : > { %p3289_p6 = pneg %p3288_p12 }
 0x110   : > { %p3296_p3 = pnand %p3295_p5, %p3289_p6 }
 0x112   : > { %3299 = shalt.err (!%p3296_p3)
}
 0x113   : > { %2929 = dma.hbm_to_vmem [thread:$0]  (!%p4634_p13), %s4636_s25, 32, %s696_s20, [#allocation15]  }
 0x114   : > { %s3582_s21 = smov [#allocation19]   ;;  %s3300_s14 = scalar_lea.hbm %s4532_s12, 1536 }
 0x115   : > { %s721_s10 = sshll.u32 %s3582_s21, 4  ;;  %p3301_p0 = scmp.ne.s32.totalorder %s4532_s12, %s3300_s14  ;;  %s722_s10 = int_to_ptr.vmem [resolvable:$true] %s721_s10 }
 0x116   : > { %p3307_p4 = scmp.lt.u32.totalorder %s3300_s14, %s4532_s12 }
 0x117   : > { %p3303_p9 = pnand %p3301_p0, %p4633_p8 }
 0x119   : > { %p3304_p7 = pneg %p3303_p9 }
 0x11b   : > { %p3309_p1 = pnand %p3307_p4, %p3304_p7 }
 0x11d   : > { %3312 = shalt.err (!%p3309_p1)
}
 0x11e   : > { %s3313_s20 = scalar_lea.vmem %s722_s10, 1536  ;;  %p3321_p11 = scmp.lt.s32.totalorder %s722_s10, %s722_s10 }
 0x11f   : > { %p3314_p10 = scmp.ne.s32.totalorder %s722_s10, %s3313_s20  ;;  %p3322_p2 = scmp.lt.s32.totalorder %s3313_s20, %s3313_s20 }
 0x121   : > { %p3316_p12 = pnand %p3314_p10, %p4633_p8  ;;  %p3323_p5 = por %p3322_p2, %p3321_p11 }
 0x123   : > { %p3317_p6 = pneg %p3316_p12 }
 0x125   : > { %p3324_p3 = pnand %p3323_p5, %p3317_p6 }
 0x127   : > { %3327 = shalt.err (!%p3324_p3)
}
 0x128   : > { %s3583_s29 = smov 64   ;;  %s3584_s6 = smov 4  }
 0x129   : > { %2935 = dma.hbm_to_vmem [thread:$0]  (!%p4634_p13), %s4532_s12, 1536, %s722_s10, [#allocation18], %s3583_s29, %s3583_s29, %s3584_s6  }
 0x12a   : > { %s3585_s24 = smov [#allocation22]   ;;  %s3586_s17 = smov [#allocation23]  }
 0x12b   : > { %s751_s14 = sshll.u32 %s3585_s24, 4  ;;  %s779_s0 = sshll.u32 %s3586_s17, 4  ;;  %s752_s14 = int_to_ptr.vmem [resolvable:$true] %s751_s14  ;;  %s4025_s0 = int_to_ptr.vmem [resolvable:$true] %s779_s0 }
 0x12c   : > { %s3328_s20 = scalar_lea.hbm %s4535_s15, 16 }
 0x12d   : > { %p3329_p0 = scmp.ne.s32.totalorder %s4535_s15, %s3328_s20  ;;  %p3335_p4 = scmp.lt.u32.totalorder %s3328_s20, %s4535_s15 }
 0x12f   : > { %p3331_p9 = pnand %p3329_p0, %p4633_p8 }
 0x131   : > { %p3332_p7 = pneg %p3331_p9 }
 0x133   : > { %p3337_p1 = pnand %p3335_p4, %p3332_p7 }
 0x135   : > { %3340 = shalt.err (!%p3337_p1)
}
 0x136   : > { %s3341_s18 = scalar_lea.vmem %s752_s14, 16  ;;  %s3348_s24 = scalar_lea.vmem %s752_s14, 32 }
 0x137   : > { %p3342_p10 = scmp.ne.s32.totalorder %s752_s14, %s3341_s18  ;;  %p3349_p11 = scmp.lt.s32.totalorder %s752_s14, %s752_s14 }
 0x138   : > { %p3350_p2 = scmp.lt.s32.totalorder %s3348_s24, %s3341_s18 }
 0x139   : > { %p3344_p12 = pnand %p3342_p10, %p4633_p8 }
 0x13a   : > { %p3351_p5 = por %p3350_p2, %p3349_p11 }
 0x13b   : > { %p3345_p6 = pneg %p3344_p12 }
 0x13d   : > { %p3352_p3 = pnand %p3351_p5, %p3345_p6 }
 0x13f   : > { %3355 = shalt.err (!%p3352_p3)
}
 0x140   : > { %2941 = dma.hbm_to_vmem [thread:$0]  (!%p4634_p13), %s4535_s15, 16, %s752_s14, [#allocation21]  }
 0x141   : > { %s3356_s13 = scalar_lea.hbm %s4542_s22, 256 }
 0x142   : > { %p3357_p0 = scmp.ne.s32.totalorder %s4542_s22, %s3356_s13  ;;  %p3363_p4 = scmp.lt.u32.totalorder %s3356_s13, %s4542_s22 }
 0x144   : > { %p3359_p9 = pnand %p3357_p0, %p4633_p8 }
 0x146   : > { %p3360_p7 = pneg %p3359_p9 }
 0x148   : > { %p3365_p1 = pnand %p3363_p4, %p3360_p7 }
 0x14a   : > { %3368 = shalt.err (!%p3365_p1)
}
 0x14b   : > { %s3369_s14 = scalar_lea.vmem %s4025_s0, 256  ;;  %p3377_p11 = scmp.lt.s32.totalorder %s4025_s0, %s4025_s0 }
 0x14c   : > { %p3370_p10 = scmp.ne.s32.totalorder %s4025_s0, %s3369_s14  ;;  %p3378_p2 = scmp.lt.s32.totalorder %s3369_s14, %s3369_s14 }
 0x14e   : > { %p3372_p12 = pnand %p3370_p10, %p4633_p8  ;;  %p3379_p5 = por %p3378_p2, %p3377_p11 }
 0x150   : > { %p3373_p6 = pneg %p3372_p12 }
 0x152   : > { %p3380_p3 = pnand %p3379_p5, %p3373_p6 }
 0x154   : > { %3383 = shalt.err (!%p3380_p3)
}
 0x155   : > { %2944 = dma.hbm_to_vmem [thread:$0]  (!%p4634_p13), %s4542_s22, 256, %s4025_s0, [#allocation24], %s3583_s29, %s3583_s29, %s3584_s6  }
 0x156   : > { %s2609_s8 = sshll.u32 %s3887_s19, 3  ;;  %s2610_s25 = sshll.u32 %s3570_s30, 7 }
 0x157   : > { %s4637_s13 = sld [smem:[#allocation46_spill]]  ;;  %s814_s9 = scalar_lea.vmem [#allocation3], %s2609_s8 }
 0x158   : > { %s821_s21 = sshll.u32 %s814_s9, 4  ;;  %s4638_s10 = sshll.u32 %s3887_s19, 1  ;;  %s4078_s21 = int_to_ptr.vmem [resolvable:$true] %s821_s21 }
 0x159   : > { %s4082_s18 = scalar_lea.vmem [#allocation9], %s4638_s10  ;;  %s811_s6 = scalar_lea.sflag [#allocation4], %s3887_s19 }
 0x15a   : > { %s857_s29 = sshll.u32 %s4082_s18, 4  ;;  %p4639_p13 = scmp.ne.s32.totalorder %s4629_s28, 0  ;;  %s858_s29 = int_to_ptr.vmem [resolvable:$true] %s857_s29 }
 0x15d   : > { %s4076_s20 = scalar_lea.hbm %s4637_s13, %s2610_s25  ;;  %s3389_s16 = scalar_lea.hbm %s4637_s13, 256 }
 0x15e   : > { %s3384_s0 = scalar_lea.hbm %s4076_s20, 128  ;;  %p3390_p7 = scmp.lt.u32.totalorder %s4076_s20, %s4637_s13 }
 0x15f   : > { %p3385_p8 = scmp.ne.s32.totalorder %s4076_s20, %s3384_s0  ;;  %p3391_p4 = scmp.lt.u32.totalorder %s3389_s16, %s3384_s0 }
 0x160   : > { %p3393_p10 = scmp.lt.u32.totalorder %s3384_s0, %s4076_s20 }
 0x161   : > { %p3387_p0 = pnand %p3385_p8, %p4639_p13  ;;  %p3392_p1 = por %p3391_p4, %p3390_p7 }
 0x163   : > { %p3388_p9 = pneg %p3387_p0  ;;  %p3394_p12 = por %p3393_p10, %p3392_p1 }
 0x165   : > { %p3395_p6 = pnand %p3394_p12, %p3388_p9 }
 0x167   : > { %3398 = shalt.err (!%p3395_p6)
}
 0x168   : > { %s3399_s19 = scalar_lea.vmem %s4078_s21, 128  ;;  %s3587_s17 = smov [#allocation3]  }
 0x169   : > { %p3400_p11 = scmp.ne.s32.totalorder %s4078_s21, %s3399_s19  ;;  %s3404_s7 = sshll.u32 %s3587_s17, 4  ;;  %s3405_s7 = int_to_ptr.vmem [resolvable:$false] %s3404_s7 }
 0x16a   : > { %s3406_s9 = scalar_lea.vmem %s3405_s7, 256  ;;  %p3407_p3 = scmp.lt.s32.totalorder %s4078_s21, %s3405_s7 }
 0x16b   : > { %p3402_p2 = pnand %p3400_p11, %p4639_p13  ;;  %p3408_p8 = scmp.lt.s32.totalorder %s3406_s9, %s3399_s19 }
 0x16d   : > { %p3403_p5 = pneg %p3402_p2  ;;  %p3409_p0 = por %p3408_p8, %p3407_p3 }
 0x16f   : > { %p3410_p7 = pnand %p3409_p0, %p3403_p5 }
 0x171   : > { %3413 = shalt.err (!%p3410_p7)
}
 0x172   : > { %p4640_p9 = scmp.ne.s32.totalorder %s4627_s3, 0  ;;  %s3414_s10 = scalar_lea.hbm %s3950_s23, 32 }
 0x173   : > { %p3415_p4 = scmp.ne.s32.totalorder %s3950_s23, %s3414_s10  ;;  %s3419_s24 = scalar_lea.hbm %s4631_s11, 64 }
 0x174   : > { %2948 = dma.hbm_to_vmem [thread:$0]  (!%p4640_p9), %s4076_s20, 128, %s4078_s21, %s811_s6  }
 0x175   : > { %p3417_p1 = pnand %p3415_p4, %p4639_p13  ;;  %p3420_p12 = scmp.lt.u32.totalorder %s3950_s23, %s4631_s11 }
 0x176   : > { %p3421_p6 = scmp.lt.u32.totalorder %s3419_s24, %s3414_s10  ;;  %p3423_p2 = scmp.lt.u32.totalorder %s3414_s10, %s3950_s23 }
 0x177   : > { %p3418_p10 = pneg %p3417_p1 }
 0x178   : > { %p3422_p11 = por %p3421_p6, %p3420_p12 }
 0x17a   : > { %p3424_p5 = por %p3423_p2, %p3422_p11 }
 0x17c   : > { %p3425_p3 = pnand %p3424_p5, %p3418_p10 }
 0x17e   : > { %3428 = shalt.err (!%p3425_p3)
}
 0x17f   : > { %s3429_s20 = scalar_lea.vmem %s858_s29, 32  ;;  %s3588_s21 = smov [#allocation9]  }
 0x180   : > { %p3430_p8 = scmp.ne.s32.totalorder %s858_s29, %s3429_s20  ;;  %s3434_s18 = sshll.u32 %s3588_s21, 4  ;;  %s3435_s18 = int_to_ptr.vmem [resolvable:$false] %s3434_s18 }
 0x181   : > { %s3436_s6 = scalar_lea.vmem %s3435_s18, 64  ;;  %p3437_p4 = scmp.lt.s32.totalorder %s858_s29, %s3435_s18 }
 0x182   : > { %p3432_p0 = pnand %p3430_p8, %p4639_p13  ;;  %p3438_p1 = scmp.lt.s32.totalorder %s3436_s6, %s3429_s20 }
 0x184   : > { %p3433_p7 = pneg %p3432_p0  ;;  %p3439_p9 = por %p3438_p1, %p3437_p4 }
 0x186   : > { %p3440_p6 = pnand %p3439_p9, %p3433_p7 }
 0x188   : > { %3443 = shalt.err (!%p3440_p6)
}
 0x189   : > { %p4641_p12 = scmp.ne.s32.totalorder %s4627_s3, 0  ;;  %p4642_p10 = scmp.ne.s32.totalorder %s4612_s1, 0 }
 0x18a   : > { %s4130_s28 = sand.u32 (!%p4642_p10), 1, %s3562_s2   ;;  %p4643_p13 = scmp.ne.s32.totalorder (!%p4642_p10), %s4622_s5, 0 }
 0x18b   : > { %2954 = dma.hbm_to_vmem [thread:$0]  (!%p4641_p12), %s3950_s23, 32, %s858_s29, %s3915_s4  }
 0x18c   : > { %866 = sbr.rel (%p4642_p10) target bundleno = 3208 (0xc88), region = 116  ;;  %s4133_s8 = sshll.u32 (!%p4642_p10), %s4130_s28, 3 }
 0x18d   : > { %s869_s19 = scalar_lea.sflag (!%p4642_p10), [#allocation4], %s4130_s28  ;;  %s872_s17 = scalar_lea.vmem (!%p4642_p10), [#allocation3], %s4133_s8 }
 0x193   : > { %3517 = dma.done.wait (%p4643_p13), %s869_s19, 128  }
 0x194   : > { %3519 = vsyncadd (%p4643_p13), %s869_s19, 4294967168  ;;  %s877_s1 = sand.u32 1, %s3752_s26   ;;  %s2617_s4 = sshll.u32 %s4130_s28, 1 }
 0x195   : > { %s878_s3 = scalar_lea.sflag [#allocation8], %s877_s1  ;;  %s4143_s23 = scalar_lea.vmem [#allocation7], %s2617_s4 }
 0x196   : > { %3521 = dma.done.wait (%p4643_p13), %s878_s3, 64  }
 0x197   : > { %3523 = vsyncadd (%p4643_p13), %s878_s3, 4294967232  ;;  %s4149_s29 = scalar_lea.vmem [#allocation9], %s2617_s4  ;;  %p4644_p9 = scmp.eq.s32.totalorder %s3752_s26, 0 }
 0x199   : > { %3525 = dma.done.wait (%p4644_p9), [#allocation6], 32   ;;  %p4645_p11 = pmov %p4644_p9 }
 0x19a   : > { %p4646_p2 = pmov %p4644_p9 }
 0x19b   : > { %3527 = vsyncadd (%p4645_p11), [#allocation6], 4294967264 }
 0x19c   : > { %3529 = dma.done.wait (%p4646_p2), [#allocation12], 256   ;;  %p4647_p5 = pmov %p4646_p2 }
 0x19d   : > { %p4648_p3 = pmov %p4646_p2 }
 0x19e   : > { %3531 = vsyncadd (%p4647_p5), [#allocation12], 4294967040 }
 0x19f   : > { %3533 = dma.done.wait (%p4648_p3), [#allocation15], 48   ;;  %p4649_p8 = pmov %p4646_p2 }
 0x1a0   : > { %p4650_p0 = pmov %p4646_p2 }
 0x1a1   : > { %3535 = vsyncadd (%p4649_p8), [#allocation15], 4294967248 }
 0x1a2   : > { %3537 = dma.done.wait (%p4650_p0), [#allocation18], 1568   ;;  %p4651_p7 = pmov %p4650_p0 }
 0x1a3   : > { %p4652_p4 = pmov %p4650_p0 }
 0x1a4   : > { %3539 = vsyncadd (%p4651_p7), [#allocation18], 4294965728 }
 0x1a5   : > { %3541 = dma.done.wait (%p4652_p4), [#allocation21], 48   ;;  %p4653_p1 = pmov %p4650_p0 }
 0x1a6   : > { %p4654_p6 = pmov %p4650_p0 }
 0x1a7   : > { %3543 = vsyncadd (%p4653_p1), [#allocation21], 4294967248 }
 0x1a8   : > { %3545 = dma.done.wait (%p4654_p6), [#allocation24], 256   ;;  %p4655_p12 = pmov %p4650_p0 }
 0x1aa   : > { %3547 = vsyncadd (%p4655_p12), [#allocation24], 4294967040 }
 0x1ab   : > { %935 = sfence }
 0x1ac   : > { %v1034_v0 = vld [vmem:[#allocation16] sm:$0x3]  ;;  %vm1046_vm0 = vcmask 1041408   ;;  %p1021_p10 = scmp.lt.s32.totalorder %s3752_s26, 1  ;;  %v3589_v1 = vmov 0.0   ;;  %vm3590_vm1 = vmmov 0  }
 0x1ad   : > { %2742 = vmatprep.subr.bf16.mxu0 %v3589_v1  ;;  %v1048_v2 = vsel %vm1046_vm0, %v1034_v0, 0  ;;  %2744 = vmatprep.mubr.msk.bf16.mxu0 %vm3590_vm1, %v3589_v1  ;;  %s4180_s5 = sshll.u32 %s3752_s26, 7  ;;  %vm1042_vm2 = vcmask 31744   ;;  %s4656_s24 = sld [smem:[#allocation44_spill]]  ;;  %v1720_v4 = vld [vmem:[#allocation13] sm:$0xff]  ;;  %vm1121_vm0 = vcmask 261120  }
 0x1ae   : > { %2743 = vmatpush3.bf16.msra.mxu0 %v1048_v2  ;;  %s4684_s26 = smov (!%p1021_p10, %s3752_s26), 1  ;;  %2748 = vmatprep.subr.bf16.mxu1 %v3589_v1  ;;  %s1603_s7 = sadd.s32 1, %s4180_s5  ;;  %v4196_v6 = vld [vmem:[#allocation14] ss:$0 sm:$0xff]  ;;  %v3591_v21 = vmov 683565275  }
 0x1af   : > { %2752 = vmatprep.mubr.msk.bf16.mxu1 %vm3590_vm1, %v3589_v1  ;;  %2756 = vmatprep.subr.bf16.mxu0 %v3589_v1  ;;  %s2631_s9 = sshll.u32 %s4684_s26, 3  ;;  %s1604_s10 = sld [smem:[#allocation10 + %s1603_s7]]  ;;  %v3592_v23 = vmov 2475754826   ;;  %v3593_v25 = vmov 2131351028  }
 0x1b0   : > { %v3594_v27 = vmov 2102212464   ;;  %v3595_v29 = vmov 920167782   ;;  %v3596_v36 = vmov 1326507024  }
 0x1b1   : > { %s4657_s21 = sld [smem:[#allocation45_spill]]  ;;  %s4658_s1 = sld [smem:[#allocation54_spill]] }
 0x1b2   : > { %s3597_s3 = smov 96   ;;  %s4659_s7 = sld [smem:[#allocation58_spill]] }
 0x1b3   : > { %s1024_s16 = scalar_lea.vmem %s4656_s24, %s2631_s9  ;;  %s1602_s0 = sld [smem:[#allocation10 + %s4180_s5]] }
 0x1b4   : > { %v1032_v3 = vld [vmem:[%s1024_s16] sm:$0xff]  ;;  %s4660_s16 = sld [smem:[#allocation57_spill]]  ;;  %s4663_s6 = sld [smem:[#allocation59_spill]] }
 0x1b5   : > { %v1033_v5 = vpack.c.bf16 %v1032_v3, %v1032_v3  ;;  %v1721_v7 = vstv %s1604_s10  ;;  %s4664_s4 = sld [smem:[#allocation60_spill]]  ;;  %s4666_s14 = sld [smem:[#allocation62_spill]] }
 0x1b6   : > { %v1722_v8 = vmul.f32 %v1721_v7, %v1720_v4  ;;  %s4670_s10 = sld [smem:[#allocation65_spill]]  ;;  %s2298_s24 = scalar_lea.sflag [#allocation5], %s4130_s28 }
 0x1b7   : > { %2745 = vmatmul.mubr.msk.bf16.vlgmr.msra.gmra.mrb[0].mxu0 %vm1042_vm2, %v1033_v5  ;;  %s1028_s18 = scalar_lea.vmem %s4657_s21, %s2631_s9  ;;  %vm1171_vm2 = vcmask 254976   ;;  %s4665_s9 = sld [smem:[#allocation61_spill]] }
 0x1b8   : > { %2760 = vmatprep.mubr.msk.bf16.mxu0 %vm3590_vm1, %v3589_v1  ;;  %v4201_v9 = vadd.f32 %v4196_v6, %v1722_v8  ;;  %1172 = vst.msk [vmem:[#allocation2] sm:$0x3] %vm1171_vm2, %v3589_v1  ;;  %vm2082_vm2 = vcmask 64512   ;;  %s3599_s20 = smov [#allocation25]  }
 0x1b9   : > { %s3448_s21 = sshll.u32 %s3599_s20, 4  ;;  %s3449_s21 = int_to_ptr.vmem [resolvable:$false] %s3448_s21 }
 0x1ba   : > { %v1724_v10 = vand.u32 2147483647, %v4201_v9  ;;  %v1727_v11 = vand.u32 2139095040, %v4201_v9  ;;  %vm1726_vm10 = vcmp.lt.s32.totalorder %v4201_v9, 0  ;;  %vm1816_vm15 = vweird.f32 %v4201_v9 }
 0x1bc   : > { %v1728_v12 = vshrl.u32 %v1727_v11, 23  ;;  %v1731_v13 = vand.u32 8388607, %v1724_v10  ;;  %vm1725_vm11 = vcmp.le.f32.partialorder %v1724_v10, 0.7853982 }
 0x1be   : > { %v2667_v14 = vadd.s32 4294967169, %v1728_v12  ;;  %v1732_v18 = vor.u32 8388608, %v1731_v13 }
 0x1c0   : > { %v1734_v15 = vadd.s32 1, %v2667_v14  ;;  %v1772_v38 = vshll.u32 %v1732_v18, 8 }
 0x1c2   : > { %vm1735_vm3 = vcmp.gt.s32.totalorder %v1734_v15, 0 }
 0x1c3   : > { %v1736_v16 = vsel %vm1735_vm3, %v1734_v15, 0 }
 0x1c4   : > { %v1738_v17 = vand.u32 31, %v1736_v16  ;;  %v1737_v19 = vshrl.u32 %v1736_v16, 5 }
 0x1c6   : > { %v1739_v20 = vsub.s32 32, %v1738_v17  ;;  %v1741_v22 = vshll.u32 %v3591_v21, %v1738_v17  ;;  %v1744_v24 = vshll.u32 %v3592_v23, %v1738_v17  ;;  %v1747_v26 = vshll.u32 %v3593_v25, %v1738_v17 }
 0x1c7   : > { %v1750_v28 = vshll.u32 %v3594_v27, %v1738_v17  ;;  %v1753_v30 = vshll.u32 %v3595_v29, %v1738_v17  ;;  %vm1756_vm4 = vcmp.lt.s32.totalorder %v1737_v19, 1  ;;  %vm1759_vm5 = vcmp.lt.s32.totalorder %v1737_v19, 4 }
 0x1c8   : > { %v1740_v31 = vshrl.u32 %v3591_v21, %v1739_v20  ;;  %v1742_v32 = vshrl.u32 %v3592_v23, %v1739_v20  ;;  %v1745_v33 = vshrl.u32 %v3593_v25, %v1739_v20  ;;  %v1748_v34 = vshrl.u32 %v3594_v27, %v1739_v20 }
 0x1c9   : > { %v1751_v35 = vshrl.u32 %v3595_v29, %v1739_v20  ;;  %v1754_v37 = vshrl.u32 %v3596_v36, %v1739_v20  ;;  %vm1757_vm6 = vcmp.lt.s32.totalorder %v1737_v19, 2  ;;  %vm1758_vm7 = vcmp.lt.s32.totalorder %v1737_v19, 3 }
 0x1ca   : > { %v1743_v39 = vor.u32 %v1742_v32, %v1741_v22  ;;  %v1746_v40 = vor.u32 %v1745_v33, %v1744_v24  ;;  %v1749_v41 = vor.u32 %v1748_v34, %v1747_v26 }
 0x1cb   : > { %v1752_v42 = vor.u32 %v1751_v35, %v1750_v28  ;;  %v1755_v43 = vor.u32 %v1754_v37, %v1753_v30 }
 0x1cc   : > { %v1760_v44 = vsel %vm1756_vm4, %v1740_v31, %v1743_v39  ;;  %v1761_v45 = vsel %vm1759_vm5, %v1749_v41, 2102212464  ;;  %v1764_v46 = vsel %vm1756_vm4, %v1743_v39, %v1746_v40  ;;  %v1768_v47 = vsel %vm1756_vm4, %v1746_v40, %v1749_v41 }
 0x1cd   : > { %v1762_v48 = vsel %vm1758_vm7, %v1746_v40, %v1761_v45  ;;  %v1765_v49 = vsel %vm1759_vm5, %v1752_v42, 920167782  ;;  %v1769_v50 = vsel %vm1759_vm5, %v1755_v43, 1326507024  ;;  %v1830_v45 = vld [vmem:[%s1028_s18] sm:$0xff]  ;;  %s4667_s18 = sld [smem:[#allocation63_spill]] }
 0x1ce   : > { %v1766_v51 = vsel %vm1758_vm7, %v1749_v41, %v1765_v49  ;;  %v1770_v52 = vsel %vm1758_vm7, %v1752_v42, %v1769_v50  ;;  %v1763_v53 = vsel %vm1757_vm6, %v1760_v44, %v1762_v48  ;;  %v3041_v42 = vld [vmem:[%s4658_s1] sm:$0xff]   ;;  %v3042_v48 = vld [vmem:[%s4658_s1 + $0x8] sm:$0xff]   ;;  %v1090_v50 = vlaneseq }
 0x1cf   : > { %v1767_v54 = vsel %vm1757_vm6, %v1764_v46, %v1766_v51  ;;  %v1771_v55 = vsel %vm1757_vm6, %v1768_v47, %v1770_v52  ;;  %v1779_v60 = vmul.u32 %v1772_v38, %v1763_v53  ;;  %2749 = vmatpush3.bf16.msra.mxu1 %v3041_v42  ;;  %v1030_v52 = vld [vmem:[%s4143_s23] sm:$0x3]  ;;  %v2633_v53 = vld [vmem:[#allocation17] ss:$0 sm:$0xff]  ;;  %s4669_s23 = sld [smem:[#allocation42_spill]] }
 0x1d0   : > { %v4218_v56 = vmul.u32.u64.low %v1772_v38, %v1771_v55  ;;  %v4219_v57 = vmul.u32.u64.high %v1772_v38, %v1771_v55, %v4218_v56  ;;  %v4221_v58 = vmul.u32.u64.low %v1772_v38, %v1767_v54  ;;  %v4222_v59 = vmul.u32.u64.high %v1772_v38, %v1767_v54, %v4221_v58  ;;  %2750 = vmatprep.subr.bf16.mxu1 %v3589_v1 }
 0x1d2   : > { %vm1781_vm8 = vc.u32 %v4219_v57, %v4221_v58  ;;  %v1782_v61 = vadd.s32 1, %v4222_v59  ;;  %v1780_v12 = vadd.s32 %v4221_v58, %v4219_v57 }
 0x1d3   : > { %2751 = vmatpush3.bf16.msra.mxu1 %v3042_v48 }
 0x1d4   : > { %v1783_v62 = vsel %vm1781_vm8, %v1782_v61, %v4222_v59  ;;  %2764 = vmatprep.subr.bf16.mxu1 %v3589_v1 }
 0x1d5   : > { %v1784_v63 = vadd.s32 %v1783_v62, %v1779_v60  ;;  %p4671_p9 = scmp.ne.s32.totalorder %s4669_s23, 0 }
 0x1d7   : > { %v1785_v0 = vadd.s32 536870912, %v1784_v63 }
 0x1d9   : > { %v1786_v2 = vshrl.u32 %v1785_v0, 30  ;;  %v3044_v0 = vld [vmem:[#allocation19] sm:$0xff]  }
 0x1db   : > { %v1787_v3 = vshll.u32 %v1786_v2, 30  ;;  %v1810_v28 = vsub.s32 4, %v1786_v2 }
 0x1dd   : > { %v1788_v4 = vsub.s32 %v1784_v63, %v1787_v3  ;;  %v1811_v32 = vsel %vm1726_vm10, %v1810_v28, %v1786_v2  ;;  %v3043_v63 = vld [vmem:[#allocation19 + $0x10] sm:$0xff]   ;;  %v3045_v2 = vld [vmem:[#allocation19 + $0x18] sm:$0xff]   ;;  %v3046_v3 = vld [vmem:[#allocation19 + $0x8] sm:$0xff]  }
 0x1de   : > { %v1813_v35 = vsel %vm1725_vm11, 0, %v1811_v32  ;;  %2757 = vmatpush3.bf16.msra.mxu0 %v3043_v63 }
 0x1df   : > { %v1790_v5 = vsub.s32 0, %v1788_v4  ;;  %v1817_v37 = vadd.s32 3, %v1813_v35  ;;  %2758 = vmatprep.subr.bf16.mxu0 %v3589_v1 }
 0x1e1   : > { %v2668_v7 = vmin.u32 %v1790_v5, %v1788_v4  ;;  %v1818_v38 = vand.u32 3, %v1817_v37  ;;  %v2635_v5 = vld [vmem:[#allocation17 + $0x1] ss:$0 sm:$0xff] }
 0x1e2   : > { %2759 = vmatpush3.bf16.msra.mxu0 %v3045_v2 }
 0x1e3   : > { %v1792_v8 = vclz %v2668_v7  ;;  %vm1823_vm12 = vcmp.eq.s32.totalorder %v1818_v38, 2  ;;  %vm1820_vm13 = vcmp.eq.s32.totalorder %v1818_v38, 0  ;;  %vm1819_vm14 = vcmp.lt.s32.totalorder %v1818_v38, 2  ;;  %2772 = vmatprep.subr.bf16.mxu0 %v3589_v1 }
 0x1e5   : > { %v2669_v11 = vadd.s32 4294967294, %v1792_v8 }
 0x1e7   : > { %vm2670_vm9 = vcmp.lt.s32.totalorder %v2669_v11, 0 }
 0x1e8   : > { %v1795_v13 = vsel %vm2670_vm9, 0, %v2669_v11 }
 0x1e9   : > { %v1796_v14 = vsub.s32 32, %v1795_v13  ;;  %v1797_v15 = vshll.u32 %v1788_v4, %v1795_v13  ;;  %v1800_v16 = vsub.s32 4294967266, %v1795_v13 }
 0x1eb   : > { %v1798_v17 = vshrl.u32 %v1780_v12, %v1796_v14  ;;  %v1801_v18 = vadd.s32 127, %v1800_v16 }
 0x1ed   : > { %v1799_v19 = vor.u32 %v1798_v17, %v1797_v15  ;;  %v1802_v20 = vshll.u32 %v1801_v18, 23 }
 0x1ef   : > { %v1803_v22 = vor.u32 4788187, %v1802_v20  ;;  %v1806_v24 = vcvt.s32.f32 %v1799_v19  ;;  %v3047_v19 = vld [vmem:[#allocation19 + $0x20] sm:$0xff]  }
 0x1f1   : > { %v1804_v26 = vand.u32 2147483647, %v1803_v22 }
 0x1f3   : > { %v1807_v30 = vmul.f32 %v1806_v24, %v1804_v26  ;;  %v3048_v24 = vld [vmem:[#allocation19 + $0x28] sm:$0xff]  }
 0x1f5   : > { %v1808_v31 = vxor.u32 2147483648, %v1807_v30 }
 0x1f7   : > { %v1809_v33 = vsel %vm1726_vm10, %v1808_v31, %v1807_v30 }
 0x1f8   : > { %v1812_v34 = vsel %vm1725_vm11, %v4201_v9, %v1809_v33  ;;  %v4249_v9 = vshrl.u32 %v1090_v50, 7 }
 0x1f9   : > { %3065 = vcosq.f32 %v1812_v34 }
 0x1fa   : > { %3067 = vsinq.f32 %v1812_v34  ;;  %v1092_v51 = vsub.s32 0, %v4249_v9  ;;  %v1167_v4 = vsub.s32 1, %v4249_v9 }
 0x1fc   : > { %v1093_v54 = vrot.slane %v1030_v52, %v1092_v51  ;;  %v1168_v7 = vrot.slane %v1030_v52, %v1167_v4  ;;  %v3049_v52 = vld [vmem:[#allocation19 + $0x40] sm:$0xff]  }
 0x203   : > { %v3066_v39 = vpop.eup %3065 }
 0x204   : > { %v3068_v40 = vpop.eup %3067  ;;  %v1824_v10 = vxor.u32 2147483648, %v3066_v39 }
 0x205   : > { %v1821_v41 = vxor.u32 2147483648, %v3068_v40 }
 0x206   : > { %v1825_v43 = vsel %vm1823_vm12, %v1824_v10, %v3068_v40  ;;  %v2648_v10 = vld [vmem:[#allocation20] ss:$0 sm:$0xff] }
 0x207   : > { %v1822_v44 = vsel %vm1820_vm13, %v3066_v39, %v1821_v41 }
 0x208   : > { %v1826_v46 = vsel %vm1819_vm14, %v1822_v44, %v1825_v43 }
 0x209   : > { %v1827_v47 = vsel %vm1816_vm15, nan, %v1826_v46 }
 0x20a   : > { %v4245_v49 = vadd.f32 %v1830_v45, %v1827_v47 }
 0x28a   : > { %v1084_v55 = vpop.f32.mrb[0].mxu0 }
 0x28b   : > { %v1085_v56 = vadd.f32 %v2633_v53, %v1084_v55  ;;  %v2746_v57 = vpop.f32.mrb[1].mxu0  ;;  %v3050_v53 = vld [vmem:[#allocation19 + $0x30] sm:$0xff]   ;;  %v3052_v55 = vld [vmem:[#allocation19 + $0x38] sm:$0xff]  }
 0x28c   : > { %v1087_v58 = vpop.f32.mrb[2].mxu0  ;;  %v4287_v57 = vld [vmem:[%s4149_s29] sm:$0x3] }
 0x28d   : > { %v1094_v59 = vadd.f32 %v1093_v54, %v1085_v56  ;;  %v2747_v60 = vpop.f32.mrb[3].mxu0  ;;  %v3051_v54 = vld [vmem:[#allocation19 + $0x48] sm:$0xff]   ;;  %v1371_v58 = vrot.slane %v4287_v57, %v1092_v51  ;;  %v3054_v51 = vld [vmem:[#allocation19 + $0x58] sm:$0xff]  }
 0x28f   : > { %v1095_v61 = vmax.f32 %v1094_v59, 0.0 }
 0x291   : > { %v1096_v62 = vpack.c.bf16 %v1095_v61, %v1095_v61 }
 0x293   : > { %2753 = vmatmul.mubr.msk.bf16.vlgmr.msra.gmra.mrb[0].mxu1 %vm1121_vm0, %v1096_v62 }
 0x294   : > { %2768 = vmatprep.mubr.msk.bf16.mxu1 %vm3590_vm1, %v3589_v1  ;;  %2765 = vmatpush3.bf16.msra.mxu1 %v3044_v0 }
 0x295   : > { %2766 = vmatprep.subr.bf16.mxu1 %v3589_v1 }
 0x298   : > { %2767 = vmatpush3.bf16.msra.mxu1 %v3046_v3  ;;  %v3053_v3 = vld [vmem:[#allocation19 + $0x50] sm:$0xff]  }
 0x299   : > { %2780 = vmatprep.subr.bf16.mxu1 %v3589_v1 }
 0x366   : > { %v1159_v8 = vpop.f32.mrb[0].mxu1 }
 0x367   : > { %v1160_v11 = vadd.f32 %v2635_v5, %v1159_v8  ;;  %v2754_v12 = vpop.f32.mrb[1].mxu1 }
 0x368   : > { %v1162_v13 = vpop.f32.mrb[2].mxu1  ;;  %v3055_v12 = vld [vmem:[%s4659_s7] sm:$0xff]  }
 0x369   : > { %v4266_v14 = vadd.f32 %v1168_v7, %v1160_v11  ;;  %v2755_v15 = vpop.f32.mrb[3].mxu1  ;;  %v3056_v13 = vld [vmem:[%s4659_s7 + $0x8] sm:$0xff]  }
 0x36a   : > { %v1606_v15 = vld [vmem:[#allocation11] sm:$0xff] }
 0x36b   : > { %v1170_v16 = vmax.f32 %v4266_v14, 0.0  ;;  %v1832_v14 = vpack.c.bf16 %v4245_v49, %v4245_v49 }
 0x36d   : > { %1173 = vst.msk [vmem:[#allocation2 + $0x2] sm:$0xff] %vm1121_vm0, %v1170_v16 }
 0x374   : > { %v1180_v17 = vld [vmem:[#allocation2 + $0x1] sm:$0xff] }
 0x375   : > { %v1174_v18 = vld [vmem:[#allocation2] sm:$0xff]  ;;  %v1181_v20 = vpack.c.bf16 %v1180_v17, %v1180_v17 }
 0x376   : > { %v1175_v22 = vpack.c.bf16 %v1174_v18, %v1174_v18  ;;  %v1297_v26 = vld [vmem:[#allocation2 + $0x2] sm:$0xff] }
 0x377   : > { %2761 = vmatmul.mubr.msk.bf16.vlgmr.msra.gmra.mrb[4].mxu0 %vm1121_vm0, %v1181_v20  ;;  %v1298_v28 = vpack.c.bf16 %v1297_v26, %v1297_v26 }
 0x378   : > { %2769 = vmatmul.mubr.msk.bf16.vlgmr.msra.gmra.mrb[4].mxu1 %vm1121_vm0, %v1175_v22  ;;  %2773 = vmatpush3.bf16.msra.mxu0 %v3047_v19 }
 0x379   : > { %2776 = vmatprep.mubr.msk.bf16.mxu0 %vm3590_vm1, %v3589_v1  ;;  %2774 = vmatprep.subr.bf16.mxu0 %v3589_v1 }
 0x37a   : > { %2784 = vmatprep.mubr.msk.bf16.mxu1 %vm3590_vm1, %v3589_v1  ;;  %2781 = vmatpush3.bf16.msra.mxu1 %v3049_v52 }
 0x37b   : > { %2782 = vmatprep.subr.bf16.mxu1 %v3589_v1 }
 0x37c   : > { %2775 = vmatpush3.bf16.msra.mxu0 %v3048_v24 }
 0x37d   : > { %2788 = vmatprep.subr.bf16.mxu0 %v3589_v1 }
 0x37e   : > { %2783 = vmatpush3.bf16.msra.mxu1 %v3051_v54 }
 0x37f   : > { %2777 = vmatmul.mubr.msk.bf16.vlgmr.msra.gmra.mrb[8].mxu0 %vm1121_vm0, %v1298_v28  ;;  %2796 = vmatprep.subr.bf16.mxu1 %v3589_v1 }
 0x380   : > { %2792 = vmatprep.mubr.msk.bf16.mxu0 %vm3590_vm1, %v3589_v1  ;;  %2789 = vmatpush3.bf16.msra.mxu0 %v3050_v53 }
 0x381   : > { %2790 = vmatprep.subr.bf16.mxu0 %v3589_v1 }
 0x384   : > { %2791 = vmatpush3.bf16.msra.mxu0 %v3052_v55 }
 0x385   : > { %2804 = vmatprep.subr.bf16.mxu0 %v3589_v1 }
 0x44a   : > { %v1236_v30 = vpop.f32.mrb[4].mxu0 }
 0x44b   : > { %v1291_v31 = vpop.f32.mrb[4].mxu1  ;;  %v2762_v33 = vpop.f32.mrb[5].mxu0 }
 0x44c   : > { %v1292_v32 = vadd.f32 %v1291_v31, %v1236_v30  ;;  %v2770_v34 = vpop.f32.mrb[5].mxu1  ;;  %v1239_v35 = vpop.f32.mrb[6].mxu0 }
 0x44d   : > { %v1294_v37 = vpop.f32.mrb[6].mxu1  ;;  %v2763_v38 = vpop.f32.mrb[7].mxu0 }
 0x44e   : > { %v2771_v39 = vpop.f32.mrb[7].mxu1  ;;  %v2659_v38 = vld [vmem:[#allocation20 + $0x1] ss:$0 sm:$0xff] }
 0x452   : > { %v1353_v40 = vpop.f32.mrb[8].mxu0 }
 0x453   : > { %v1359_v41 = vadd.f32 %v1353_v40, %v1292_v32  ;;  %v2778_v42 = vpop.f32.mrb[9].mxu0 }
 0x454   : > { %v1356_v43 = vpop.f32.mrb[10].mxu0 }
 0x455   : > { %v1367_v44 = vadd.f32 %v2648_v10, %v1359_v41  ;;  %v2779_v45 = vpop.f32.mrb[11].mxu0 }
 0x457   : > { %v2649_v46 = vmul.f32 -1.442695, %v1367_v44  ;;  %v1372_v59 = vadd.f32 %v1371_v58, %v1367_v44 }
 0x459   : > { %3069 = vpow2.f32 %v2649_v46 }
 0x463   : > { %v3070_v47 = vpop.eup %3069 }
 0x464   : > { %v1376_v48 = vadd.f32 1.0, %v3070_v47 }
 0x466   : > { %3071 = vrcp.f32 %v1376_v48 }
 0x470   : > { %v3072_v56 = vpop.eup %3071 }
 0x471   : > { %1380 = vrot.lane.b32.xlu0 %v3072_v56, %s3597_s3 }
 0x4e3   : > { %v1381_v60 = vpop.permute.xlu0 %1380 }
 0x4e4   : > { %v1383_v61 = vmul.f32 %v1381_v60, %v1372_v59 }
 0x4e6   : > { %v1384_v62 = vadd.f32 %v1383_v61, %v1170_v16  ;;  %v1607_v16 = vstv %s1602_s0  ;;  %v3057_v61 = vld [vmem:[%s4660_s16] sm:$0xff]   ;;  %s4450_s0 = scalar_lea.hbm %s4670_s10, %s4180_s5 }
 0x4e7   : > { %v1608_v17 = vmul.f32 %v1607_v16, %v1606_v15 }
 0x4e8   : > { %v4292_v63 = vmul.f32 0.70710677, %v1384_v62 }
 0x4e9   : > { %v4322_v18 = vadd.f32 %v4196_v6, %v1608_v17 }
 0x4ea   : > { %1386 = vst.msk [vmem:[#allocation2 + $0x2] sm:$0xff] %vm1121_vm0, %v4292_v63 }
 0x4eb   : > { %v1619_v19 = vand.u32 2139095040, %v4322_v18  ;;  %v1616_v47 = vand.u32 2147483647, %v4322_v18  ;;  %vm1618_vm10 = vcmp.lt.s32.totalorder %v4322_v18, 0  ;;  %vm1708_vm15 = vweird.f32 %v4322_v18 }
 0x4ed   : > { %v1620_v20 = vshrl.u32 %v1619_v19, 23  ;;  %vm4376_vm11 = vcmp.le.f32.partialorder %v1616_v47, 0.7853982 }
 0x4ef   : > { %v2663_v34 = vadd.s32 4294967169, %v1620_v20 }
 0x4f1   : > { %v1394_v0 = vld [vmem:[#allocation2 + $0x1] sm:$0xff]  ;;  %v1626_v35 = vadd.s32 1, %v2663_v34 }
 0x4f2   : > { %v1387_v2 = vld [vmem:[#allocation2] sm:$0xff]  ;;  %v1395_v5 = vpack.c.bf16 %v1394_v0, %v1394_v0 }
 0x4f3   : > { %v1388_v7 = vpack.c.bf16 %v1387_v2, %v1387_v2  ;;  %v1511_v8 = vld [vmem:[#allocation2 + $0x2] sm:$0xff]  ;;  %vm1627_vm3 = vcmp.gt.s32.totalorder %v1626_v35, 0 }
 0x4f4   : > { %2785 = vmatmul.mubr.msk.bf16.vlgmr.msra.gmra.mrb[8].mxu1 %vm1121_vm0, %v1395_v5  ;;  %v1512_v11 = vpack.c.bf16 %v1511_v8, %v1511_v8  ;;  %v1628_v43 = vsel %vm1627_vm3, %v1626_v35, 0  ;;  %v3058_v5 = vld [vmem:[%s4660_s16 + $0x8] sm:$0xff]   ;;  %vm2099_vm3 = vcmask 1043456  }
 0x4f5   : > { %2793 = vmatmul.mubr.msk.bf16.vlgmr.msra.gmra.mrb[12].mxu0 %vm1121_vm0, %v1388_v7  ;;  %2797 = vmatpush3.bf16.msra.mxu1 %v3053_v3  ;;  %v1630_v44 = vand.u32 31, %v1628_v43  ;;  %v1629_v54 = vshrl.u32 %v1628_v43, 5 }
 0x4f6   : > { %2800 = vmatprep.mubr.msk.bf16.mxu1 %vm3590_vm1, %v3589_v1  ;;  %2798 = vmatprep.subr.bf16.mxu1 %v3589_v1 }
 0x4f7   : > { %2808 = vmatprep.mubr.msk.bf16.mxu0 %vm3590_vm1, %v3589_v1  ;;  %v1631_v45 = vsub.s32 32, %v1630_v44  ;;  %v1642_v48 = vshll.u32 %v3594_v27, %v1630_v44  ;;  %v1645_v55 = vshll.u32 %v3595_v29, %v1630_v44  ;;  %v1633_v58 = vshll.u32 %v3591_v21, %v1630_v44  ;;  %2805 = vmatpush3.bf16.msra.mxu0 %v3057_v61 }
 0x4f8   : > { %v1636_v59 = vshll.u32 %v3592_v23, %v1630_v44  ;;  %v1639_v60 = vshll.u32 %v3593_v25, %v1630_v44  ;;  %vm1651_vm4 = vcmp.lt.s32.totalorder %v1629_v54, 4  ;;  %2806 = vmatprep.subr.bf16.mxu0 %v3589_v1  ;;  %vm1648_vm5 = vcmp.lt.s32.totalorder %v1629_v54, 1 }
 0x4f9   : > { %2799 = vmatpush3.bf16.msra.mxu1 %v3054_v51  ;;  %v1643_v52 = vshrl.u32 %v3595_v29, %v1631_v45  ;;  %v1646_v56 = vshrl.u32 %v3596_v36, %v1631_v45  ;;  %v1634_v62 = vshrl.u32 %v3592_v23, %v1631_v45  ;;  %v1637_v0 = vshrl.u32 %v3593_v25, %v1631_v45 }
 0x4fa   : > { %2812 = vmatprep.subr.bf16.mxu1 %v3589_v1  ;;  %v1640_v2 = vshrl.u32 %v3594_v27, %v1631_v45  ;;  %v1623_v36 = vand.u32 8388607, %v1616_v47  ;;  %vm1650_vm6 = vcmp.lt.s32.totalorder %v1629_v54, 3  ;;  %vm1649_vm7 = vcmp.lt.s32.totalorder %v1629_v54, 2 }
 0x4fb   : > { %v1644_v29 = vor.u32 %v1643_v52, %v1642_v48  ;;  %v1647_v3 = vor.u32 %v1646_v56, %v1645_v55  ;;  %v1635_v7 = vor.u32 %v1634_v62, %v1633_v58  ;;  %v1638_v51 = vor.u32 %v1637_v0, %v1636_v59  ;;  %2807 = vmatpush3.bf16.msra.mxu0 %v3058_v5  ;;  %v3061_v0 = vld [vmem:[%s4666_s14] sm:$0xff]  }
 0x4fc   : > { %2801 = vmatmul.mubr.msk.bf16.vlgmr.msra.gmra.mrb[12].mxu1 %vm1121_vm0, %v1512_v11  ;;  %v1641_v23 = vor.u32 %v1640_v2, %v1639_v60  ;;  %v1624_v27 = vor.u32 8388608, %v1623_v36  ;;  %2820 = vmatprep.subr.bf16.mxu0 %v3589_v1 }
 0x4fd   : > { %2816 = vmatprep.mubr.msk.bf16.mxu1 %vm3590_vm1, %v3589_v1  ;;  %2813 = vmatpush3.bf16.msra.mxu1 %v3055_v12  ;;  %v1657_v25 = vsel %vm1651_vm4, %v1644_v29, 920167782  ;;  %v1661_v8 = vsel %vm1651_vm4, %v1647_v3, 1326507024  ;;  %v1656_v11 = vsel %vm1648_vm5, %v1635_v7, %v1638_v51 }
 0x4fe   : > { %2814 = vmatprep.subr.bf16.mxu1 %v3589_v1  ;;  %v1658_v12 = vsel %vm1650_vm6, %v1641_v23, %v1657_v25  ;;  %v1664_v16 = vshll.u32 %v1624_v27, 8 }
 0x4ff   : > { %v1659_v17 = vsel %vm1649_vm7, %v1656_v11, %v1658_v12 }
 0x501   : > { %2815 = vmatpush3.bf16.msra.mxu1 %v3056_v13  ;;  %v1660_v13 = vsel %vm1648_vm5, %v1638_v51, %v1641_v23 }
 0x502   : > { %2828 = vmatprep.subr.bf16.mxu1 %v3589_v1 }
 0x504   : > { %2817 = vmatmul.mubr.msk.bf16.vlgmr.msra.gmra.mrb[16].mxu1 %vm1121_vm0, %v1832_v14  ;;  %v1662_v14 = vsel %vm1650_vm6, %v1644_v29, %v1661_v8  ;;  %v2675_v29 = vld [vmem:[%s4663_s6] ss:$0 sm:$0xff]  ;;  %s1013_s6 = scalar_lea.vmem [#allocation25], %s4133_s8 }
 0x505   : > { %2830 = vmatprep.mubr.msk.bf16.mxu1 %vm3590_vm1, %v3589_v1  ;;  %v1663_v19 = vsel %vm1649_vm7, %v1660_v13, %v1662_v14 }
 0x5c7   : > { %v1450_v22 = vpop.f32.mrb[8].mxu1 }
 0x5c8   : > { %v1505_v49 = vpop.f32.mrb[12].mxu0  ;;  %v2786_v26 = vpop.f32.mrb[9].mxu1 }
 0x5c9   : > { %v1506_v24 = vadd.f32 %v1505_v49, %v1450_v22  ;;  %v2794_v28 = vpop.f32.mrb[13].mxu0  ;;  %v1453_v30 = vpop.f32.mrb[10].mxu1  ;;  %v4358_v20 = vmul.u32.u64.low %v1664_v16, %v1659_v17  ;;  %v4359_v22 = vmul.u32.u64.high %v1664_v16, %v1659_v17, %v4358_v20  ;;  %v1632_v49 = vshrl.u32 %v3591_v21, %v1631_v45 }
 0x5ca   : > { %v1508_v31 = vpop.f32.mrb[14].mxu0  ;;  %v2787_v32 = vpop.f32.mrb[11].mxu1  ;;  %v1653_v28 = vsel %vm1651_vm4, %v1641_v23, 2102212464 }
 0x5cb   : > { %v2795_v33 = vpop.f32.mrb[15].mxu0  ;;  %v1652_v30 = vsel %vm1648_vm5, %v1632_v49, %v1635_v7  ;;  %v1654_v31 = vsel %vm1650_vm6, %v1638_v51, %v1653_v28 }
 0x5cc   : > { %v1655_v32 = vsel %vm1649_vm7, %v1652_v30, %v1654_v31  ;;  %v1674_v33 = vadd.s32 1, %v4359_v22 }
 0x5cd   : > { %v1671_v34 = vmul.u32 %v1664_v16, %v1655_v32 }
 0x5cf   : > { %v1567_v37 = vpop.f32.mrb[12].mxu1 }
 0x5d0   : > { %v1573_v39 = vadd.f32 %v1567_v37, %v1506_v24  ;;  %v2802_v40 = vpop.f32.mrb[13].mxu1  ;;  %v4362_v24 = vmul.u32.u64.low %v1664_v16, %v1663_v19  ;;  %v4363_v26 = vmul.u32.u64.high %v1664_v16, %v1663_v19, %v4362_v24  ;;  %v1586_v19 = vrot.slane %v4287_v57, %v1167_v4  ;;  %v2671_v57 = vld [vmem:[#allocation22] ss:$0 sm:$0xff] }
 0x5d1   : > { %v1570_v6 = vpop.f32.mrb[14].mxu1 }
 0x5d2   : > { %v4325_v10 = vadd.f32 %v2659_v38, %v1573_v39  ;;  %v2803_v41 = vpop.f32.mrb[15].mxu1  ;;  %vm1673_vm8 = vc.u32 %v4363_v26, %v4358_v20 }
 0x5d3   : > { %v1675_v35 = vsel %vm1673_vm8, %v1674_v33, %v4359_v22 }
 0x5d4   : > { %v2660_v42 = vmul.f32 -1.442695, %v4325_v10  ;;  %v1676_v37 = vadd.s32 %v1675_v35, %v1671_v34  ;;  %v1587_v49 = vadd.f32 %v1586_v19, %v4325_v10 }
 0x5d6   : > { %3073 = vpow2.f32 %v2660_v42  ;;  %v1677_v21 = vadd.s32 536870912, %v1676_v37 }
 0x5d7   : > { %v1959_v5 = vpop.f32.mrb[16].mxu1 }
 0x5d8   : > { %v1678_v38 = vshrl.u32 %v1677_v21, 30  ;;  %v1960_v7 = vadd.f32 %v2675_v29, %v1959_v5  ;;  %v2818_v51 = vpop.f32.mrb[17].mxu1  ;;  %v3060_v21 = vld [vmem:[%s4664_s4 + $0x8] sm:$0xff]  }
 0x5d9   : > { %v1962_v23 = vpop.f32.mrb[18].mxu1  ;;  %v3062_v5 = vld [vmem:[%s4666_s14 + $0x8] sm:$0xff]  }
 0x5da   : > { %v1679_v39 = vshll.u32 %v1678_v38, 30  ;;  %v1702_v36 = vsub.s32 4, %v1678_v38  ;;  %v2034_v47 = vpack.c.bf16 %v1960_v7, %v1960_v7  ;;  %v2819_v27 = vpop.f32.mrb[19].mxu1 }
 0x5dc   : > { %v1680_v40 = vsub.s32 %v1676_v37, %v1679_v39  ;;  %v1703_v25 = vsel %vm1618_vm10, %v1702_v36, %v1678_v38  ;;  %v2039_v8 = vsel %vm1121_vm0, %v2034_v47, 0  ;;  %v1965_v38 = vld [vmem:[%s872_s17] sm:$0xff]  ;;  %s2316_s17 = sshll.u32 %s1013_s6, 4  ;;  %s2317_s17 = int_to_ptr.vmem [resolvable:$true] %s2316_s17 }
 0x5dd   : > { %v1705_v11 = vsel %vm4376_vm11, 0, %v1703_v25  ;;  %2829 = vmatpush3.bf16.xpose.msra.mxu1 %v2039_v8  ;;  %v1966_v39 = vpack.c.bf16 %v1965_v38, %v1965_v38  ;;  %v3063_v8 = vld [vmem:[#allocation23] sm:$0xff]   ;;  %s3444_s25 = scalar_lea.vmem %s2317_s17, 128  ;;  %p3451_p5 = scmp.lt.s32.totalorder %s2317_s17, %s3449_s21 }
 0x5de   : > { %v1682_v6 = vsub.s32 0, %v1680_v40  ;;  %2840 = vmatprep.subr.bf16.mxu1 %v3589_v1  ;;  %v1709_v12 = vadd.s32 3, %v1705_v11  ;;  %v3064_v11 = vld [vmem:[#allocation23 + $0x8] sm:$0xff]   ;;  %p3445_p13 = scmp.ne.s32.totalorder %s2317_s17, %s3444_s25 }
 0x5e0   : > { %v3074_v46 = vpop.eup %3073  ;;  %v2664_v41 = vmin.u32 %v1682_v6, %v1680_v40  ;;  %p3446_p11 = pnand %p3445_p13, %p4671_p9 }
 0x5e1   : > { %v1591_v53 = vadd.f32 1.0, %v3074_v46  ;;  %v1672_v46 = vadd.s32 %v4358_v20, %v4363_v26 }
 0x5e2   : > { %v1684_v42 = vclz %v2664_v41  ;;  %p3447_p2 = pneg %p3446_p11 }
 0x5e3   : > { %3075 = vrcp.f32 %v1591_v53 }
 0x5e4   : > { %v2665_v43 = vadd.s32 4294967294, %v1684_v42 }
 0x5e6   : > { %vm2666_vm9 = vcmp.lt.s32.totalorder %v2665_v43, 0 }
 0x5e7   : > { %v1687_v44 = vsel %vm2666_vm9, 0, %v2665_v43 }
 0x5e8   : > { %v1692_v45 = vsub.s32 4294967266, %v1687_v44  ;;  %v1688_v48 = vsub.s32 32, %v1687_v44  ;;  %v1689_v53 = vshll.u32 %v1680_v40, %v1687_v44 }
 0x5ea   : > { %v1693_v52 = vadd.s32 127, %v1692_v45  ;;  %v1690_v54 = vshrl.u32 %v1672_v46, %v1688_v48  ;;  %v2679_v45 = vld [vmem:[%s4665_s9] ss:$0 sm:$0xff] }
 0x5ec   : > { %v1694_v55 = vshll.u32 %v1693_v52, 23  ;;  %v1691_v56 = vor.u32 %v1690_v54, %v1689_v53 }
 0x5ed   : > { %v3076_v15 = vpop.eup %3075 }
 0x5ee   : > { %1595 = vrot.lane.b32.xlu0 %v3076_v15, %s3597_s3  ;;  %v1695_v58 = vor.u32 4788187, %v1694_v55  ;;  %v1698_v60 = vcvt.s32.f32 %v1691_v56  ;;  %v1710_v15 = vand.u32 3, %v1709_v12  ;;  %v2685_v12 = vld [vmem:[%s4667_s18] ss:$0 sm:$0xff]  ;;  %s4668_s3 = sld [smem:[#allocation64_spill]] }
 0x5ef   : > { %s3450_s18 = scalar_lea.vmem %s3449_s21, 256 }
 0x5f0   : > { %v1696_v59 = vand.u32 2147483647, %v1695_v58  ;;  %vm1712_vm12 = vcmp.eq.s32.totalorder %v1710_v15, 0  ;;  %vm1715_vm13 = vcmp.eq.s32.totalorder %v1710_v15, 2  ;;  %vm1711_vm14 = vcmp.lt.s32.totalorder %v1710_v15, 2  ;;  %p3452_p3 = scmp.lt.s32.totalorder %s3450_s18, %s3444_s25 }
 0x5f2   : > { %v1699_v61 = vmul.f32 %v1698_v60, %v1696_v59  ;;  %p3453_p8 = por %p3452_p3, %p3451_p5 }
 0x5f4   : > { %v1700_v62 = vxor.u32 2147483648, %v1699_v61  ;;  %p3454_p0 = pnand %p3453_p8, %p3447_p2 }
 0x5f6   : > { %v1701_v2 = vsel %vm1618_vm10, %v1700_v62, %v1699_v61 }
 0x5f7   : > { %v1704_v3 = vsel %vm4376_vm11, %v4322_v18, %v1701_v2 }
 0x5f8   : > { %3077 = vcosq.f32 %v1704_v3 }
 0x5f9   : > { %3079 = vsinq.f32 %v1704_v3 }
 0x602   : > { %v3078_v13 = vpop.eup %3077 }
 0x603   : > { %v3080_v14 = vpop.eup %3079  ;;  %v1716_v17 = vxor.u32 2147483648, %v3078_v13 }
 0x604   : > { %v1713_v16 = vxor.u32 2147483648, %v3080_v14 }
 0x605   : > { %v1717_v22 = vsel %vm1715_vm13, %v1716_v17, %v3080_v14 }
 0x606   : > { %v1714_v20 = vsel %vm1712_vm12, %v3078_v13, %v1713_v16 }
 0x607   : > { %v1718_v26 = vsel %vm1711_vm14, %v1714_v20, %v1717_v22 }
 0x608   : > { %v1719_v31 = vsel %vm1708_vm15, nan, %v1718_v26 }
 0x660   : > { %v1596_v24 = vpop.permute.xlu0 %1595 }
 0x661   : > { %v1598_v28 = vmul.f32 %v1596_v24, %v1587_v49  ;;  %v2689_v49 = vld [vmem:[%s4668_s3] ss:$0 sm:$0xff] }
 0x663   : > { %v1599_v30 = vadd.f32 %v1598_v28, %v4292_v63  ;;  %v3059_v63 = vld [vmem:[%s4664_s4] sm:$0xff]  }
 0x665   : > { %v4396_v32 = vmul.f32 0.70710677, %v1599_v30 }
 0x667   : > { %v1828_v9 = vadd.f32 %v1719_v31, %v4396_v32 }
 0x669   : > { %v1829_v4 = vpack.c.bf16 %v1828_v9, %v1828_v9 }
 0x66b   : > { %2809 = vmatmul.mubr.msk.bf16.vlgmr.msra.gmra.mrb[16].mxu0 %vm1121_vm0, %v1829_v4 }
 0x66c   : > { %2824 = vmatprep.mubr.msk.bf16.mxu0 %vm3590_vm1, %v3589_v1  ;;  %2821 = vmatpush3.bf16.msra.mxu0 %v3059_v63 }
 0x66d   : > { %2822 = vmatprep.subr.bf16.mxu0 %v3589_v1 }
 0x670   : > { %2823 = vmatpush3.bf16.msra.mxu0 %v3060_v21 }
 0x671   : > { %2834 = vmatprep.subr.bf16.mxu0 %v3589_v1 }
 0x673   : > { %2825 = vmatmul.mubr.msk.bf16.vlgmr.msra.gmra.mrb[20].mxu0 %vm1121_vm0, %v1966_v39 }
 0x674   : > { %2836 = vmatprep.mubr.msk.bf16.mxu0 %vm3590_vm1, %v3589_v1 }
 0x73e   : > { %v1893_v10 = vpop.f32.mrb[16].mxu0 }
 0x73f   : > { %v1894_v33 = vadd.f32 %v2671_v57, %v1893_v10  ;;  %v2810_v18 = vpop.f32.mrb[17].mxu0 }
 0x740   : > { %v1896_v34 = vpop.f32.mrb[18].mxu0 }
 0x741   : > { %v2033_v35 = vpack.c.bf16 %v1894_v33, %v1894_v33  ;;  %v2811_v37 = vpop.f32.mrb[19].mxu0 }
 0x743   : > { %2831 = vmatmul.mubr.msk.bf16.vlgmr.msra.gmra.mrb[20].mxu1 %vm1121_vm0, %v2033_v35 }
 0x744   : > { %2844 = vmatprep.mubr.msk.bf16.mxu1 %vm3590_vm1, %v3589_v1  ;;  %2841 = vmatpush3.bf16.msra.mxu1 %v3061_v0 }
 0x745   : > { %2842 = vmatprep.subr.bf16.mxu1 %v3589_v1 }
 0x746   : > { %v2027_v46 = vpop.f32.mrb[20].mxu0 }
 0x747   : > { %v2028_v48 = vadd.f32 %v2679_v45, %v2027_v46  ;;  %v2826_v52 = vpop.f32.mrb[21].mxu0 }
 0x748   : > { %v2030_v53 = vpop.f32.mrb[22].mxu0  ;;  %2843 = vmatpush3.bf16.msra.mxu1 %v3062_v5 }
 0x749   : > { %v2095_v54 = vpack.c.bf16 %v2028_v48, %v2028_v48  ;;  %v2827_v55 = vpop.f32.mrb[23].mxu0 }
 0x74b   : > { %v2101_v56 = vsel %vm2099_vm3, %v2095_v54, 0 }
 0x74c   : > { %2835 = vmatpush3.bf16.msra.mxu0 %v2101_v56 }
 0x74d   : > { %2848 = vmatprep.subr.bf16.mxu0 %v3589_v1 }
 0x816   : > { %v2075_v40 = vpop.f32.mrb[20].mxu1 }
 0x817   : > { %v2081_v6 = vmul.f32 0.17677669, %v2075_v40  ;;  %v2832_v41 = vpop.f32.mrb[21].mxu1 }
 0x818   : > { %v2078_v42 = vpop.f32.mrb[22].mxu1 }
 0x819   : > { %v2833_v43 = vpop.f32.mrb[23].mxu1  ;;  %v2083_v44 = vsel %vm2082_vm2, %v2081_v6, -inf }
 0x81a   : > { %2084 = vmax.xlane.f32.xlu1 %v2083_v44 }
 0x8a7   : > { %v2085_v58 = vpop.xlane.xlu1 %2084 }
 0x8a8   : > { %v2086_v59 = vsub.f32 %v2081_v6, %v2085_v58 }
 0x8aa   : > { %v2087_v60 = vmul.f32 1.442695, %v2086_v59 }
 0x8ac   : > { %3081 = vpow2.f32 %v2087_v60 }
 0x8b6   : > { %v3082_v61 = vpop.eup %3081 }
 0x8b7   : > { %v2089_v62 = vsel %vm2082_vm2, %v3082_v61, 0.0 }
 0x8b8   : > { %2090 = vadd.xlane.f32.xlu1 %v2089_v62 }
 0x945   : > { %v2091_v2 = vpop.xlane.xlu1 %2090 }
 0x946   : > { %3083 = vrcp.f32 %v2091_v2 }
 0x950   : > { %v3084_v29 = vpop.eup %3083 }
 0x951   : > { %v2093_v36 = vmul.f32 %v3084_v29, %v3082_v61 }
 0x953   : > { %v2094_v3 = vpack.c.bf16 %v2093_v36, %v2093_v36 }
 0x955   : > { %2837 = vmatmul.mubr.msk.bf16.vlgmr.msra.gmra.mrb[24].mxu0 %vm2082_vm2, %v2094_v3 }
 0x956   : > { %2852 = vmatprep.mubr.msk.bf16.mxu0 %vm3590_vm1, %v3589_v1  ;;  %2849 = vmatpush3.bf16.msra.mxu0 %v3063_v8 }
 0x957   : > { %2850 = vmatprep.subr.bf16.mxu0 %v3589_v1  ;;  %v3598_v1 = vmov 8  }
 0x958   : > { %3040 = vset.pattern.permute.xlu0 %v3598_v1 }
 0x95a   : > { %2851 = vmatpush3.bf16.msra.mxu0 %v3064_v11 }
 0xa28   : > { %v2137_v7 = vpop.f32.mrb[24].mxu0 }
 0xa29   : > { %v2143_v51 = vmul.f32 0.17677669, %v2137_v7  ;;  %v2838_v23 = vpop.f32.mrb[25].mxu0 }
 0xa2a   : > { %v2140_v25 = vpop.f32.mrb[26].mxu0 }
 0xa2b   : > { %v2144_v47 = vpack.c.bf16 %v2143_v51, %v2143_v51  ;;  %v2839_v27 = vpop.f32.mrb[27].mxu0 }
 0xa2d   : > { %2845 = vmatmul.mubr.msk.bf16.vlgmr.msra.gmra.mrb[24].mxu1 %vm1121_vm0, %v2144_v47 }
 0xb00   : > { %v2205_v13 = vpop.f32.mrb[24].mxu1 }
 0xb01   : > { %v2206_v14 = vadd.f32 %v2685_v12, %v2205_v13  ;;  %v2846_v15 = vpop.f32.mrb[25].mxu1 }
 0xb02   : > { %v2208_v16 = vpop.f32.mrb[26].mxu1 }
 0xb03   : > { %v2211_v17 = vadd.f32 %v2206_v14, %v4396_v32  ;;  %v2847_v19 = vpop.f32.mrb[27].mxu1 }
 0xb05   : > { %v2212_v20 = vmul.f32 0.70710677, %v2211_v17 }
 0xb07   : > { %v2214_v22 = vpack.c.bf16 %v2212_v20, %v2212_v20  ;;  %2213 = vst.msk [vmem:[%s1013_s6] sm:$0xff] %vm1121_vm0, %v2212_v20 }
 0xb09   : > { %2853 = vmatmul.mubr.msk.bf16.vlgmr.msra.gmra.mrb[28].mxu0 %vm1121_vm0, %v2214_v22 }
 0xbdc   : > { %v2275_v24 = vpop.f32.mrb[28].mxu0 }
 0xbdd   : > { %v2276_v26 = vadd.f32 %v2689_v49, %v2275_v24  ;;  %v2854_v28 = vpop.f32.mrb[29].mxu0 }
 0xbde   : > { %v2278_v30 = vpop.f32.mrb[30].mxu0 }
 0xbdf   : > { %v2693_v31 = vmul.f32 -1.442695, %v2276_v26  ;;  %v2855_v32 = vpop.f32.mrb[31].mxu0 }
 0xbe1   : > { %3085 = vpow2.f32 %v2693_v31 }
 0xbeb   : > { %v3086_v9 = vpop.eup %3085 }
 0xbec   : > { %v2284_v4 = vadd.f32 1.0, %v3086_v9 }
 0xbee   : > { %3087 = vrcp.f32 %v2284_v4 }
 0xbf8   : > { %v3088_v57 = vpop.eup %3087 }
 0xbf9   : > { %2292 = vperm.xlu0 %3040, %v3088_v57  }
 0xbfa   : > { %3457 = shalt.err (!%p3454_p0)
}
 0xbfb   : > { %s3458_s6 = scalar_lea.hbm %s4450_s0, 128  ;;  %s3462_s3 = scalar_lea.hbm %s4670_s10, 256 }
 0xbfc   : > { %p3459_p7 = scmp.ne.s32.totalorder %s4450_s0, %s3458_s6  ;;  %p3463_p6 = scmp.lt.u32.totalorder %s4450_s0, %s4670_s10 }
 0xbfd   : > { %p3464_p12 = scmp.lt.u32.totalorder %s3462_s3, %s3458_s6  ;;  %p3466_p13 = scmp.lt.u32.totalorder %s3458_s6, %s4450_s0 }
 0xbfe   : > { %p3460_p4 = pnand %p3459_p7, %p4671_p9 }
 0xbff   : > { %p3465_p10 = por %p3464_p12, %p3463_p6 }
 0xc00   : > { %p3461_p1 = pneg %p3460_p4 }
 0xc01   : > { %p3467_p11 = por %p3466_p13, %p3465_p10 }
 0xc03   : > { %p3468_p2 = pnand %p3467_p11, %p3461_p1 }
 0xc05   : > { %3471 = shalt.err (!%p3468_p2)
}
 0xc06   : > { %2910 = dma.vmem_to_hbm [thread:$0]  (%p4671_p9), %s2317_s17, 128, %s4450_s0, %s2298_s24   ;;  %v2288_v10 = vand.u32 127, %v1090_v50 }
 0xc07   : > { %s1020_s25 = scalar_lea.vmem [#allocation26], %s4133_s8  ;;  %s4672_s6 = sld [smem:[#allocation66_spill]] }
 0xc08   : > { %s2329_s20 = sshll.u32 %s1020_s25, 4  ;;  %vm2289_vm1 = vcmp.eq.s32.totalorder %v2288_v10, 8  ;;  %s2303_s3 = scalar_lea.sflag [#allocation27], %s4130_s28  ;;  %s4478_s20 = int_to_ptr.vmem [resolvable:$true] %s2329_s20 }
 0xc09   : > { %s3472_s17 = scalar_lea.vmem %s4478_s20, 128  ;;  %s3600_s8 = smov [#allocation26]  }
 0xc0a   : > { %p3473_p5 = scmp.ne.s32.totalorder %s4478_s20, %s3472_s17  ;;  %s3476_s0 = sshll.u32 %s3600_s8, 4  ;;  %s3477_s0 = int_to_ptr.vmem [resolvable:$false] %s3476_s0 }
 0xc0b   : > { %s3478_s24 = scalar_lea.vmem %s3477_s0, 256  ;;  %p3479_p0 = scmp.lt.s32.totalorder %s4478_s20, %s3477_s0 }
 0xc0c   : > { %p3474_p3 = pnand %p3473_p5, %p4671_p9  ;;  %p3480_p7 = scmp.lt.s32.totalorder %s3478_s24, %s3472_s17 }
 0xc0d   : > { %s4673_s19 = smov %s4672_s6  ;;  %s4476_s26 = scalar_lea.hbm %s4672_s6, %s4180_s5 }
 0xc0e   : > { %p3475_p8 = pneg %p3474_p3  ;;  %p3481_p4 = por %p3480_p7, %p3479_p0 }
 0xc10   : > { %p3482_p1 = pnand %p3481_p4, %p3475_p8 }
 0xc78   : > { %v2293_v33 = vpop.permute.xlu0 %2292 }
 0xc79   : > { %v2295_v18 = vsel %vm2289_vm1, %v2293_v33, %v2276_v26 }
 0xc7a   : > { %2296 = vst [vmem:[%s1020_s25] sm:$0xff] %v2295_v18 }
 0xc7b   : > { %3485 = shalt.err (!%p3482_p1)
}
 0xc7c   : > { %s3486_s28 = scalar_lea.hbm %s4476_s26, 128  ;;  %s3490_s9 = scalar_lea.hbm %s4673_s19, 256 }
 0xc7d   : > { %p3487_p6 = scmp.ne.s32.totalorder %s4476_s26, %s3486_s28  ;;  %p3491_p13 = scmp.lt.u32.totalorder %s4476_s26, %s4673_s19 }
 0xc7e   : > { %p3492_p11 = scmp.lt.u32.totalorder %s3490_s9, %s3486_s28  ;;  %p3494_p5 = scmp.lt.u32.totalorder %s3486_s28, %s4476_s26 }
 0xc7f   : > { %p3488_p12 = pnand %p3487_p6, %p4671_p9 }
 0xc80   : > { %p3493_p2 = por %p3492_p11, %p3491_p13 }
 0xc81   : > { %p3489_p10 = pneg %p3488_p12 }
 0xc82   : > { %p3495_p3 = por %p3494_p5, %p3493_p2 }
 0xc84   : > { %p3496_p8 = pnand %p3495_p3, %p3489_p10 }
 0xc86   : > { %3499 = shalt.err (!%p3496_p8)
}
 0xc87   : > { %2911 = dma.vmem_to_hbm [thread:$0]  (%p4671_p9), %s4478_s20, 128, %s4476_s26, %s2303_s3  }
 0xc88 PF: > { %s4674_s18 = sld [smem:[#allocation38_spill]]  ;;  %s4675_s6 = sld [smem:[#allocation43_spill]] }
 0xc89   : > { %p4677_p7 = scmp.ge.s32.totalorder %s3570_s30, 2 }
 0xc8e   : > { %s2341_s17 = sand.u32 1, %s4674_s18   ;;  %p4676_p0 = scmp.ne.s32.totalorder %s4675_s6, 0 }
 0xc8f   : > { %s2342_s8 = scalar_lea.sflag [#allocation5], %s2341_s17 }
 0xc90   : > { %p2956_p4 = pnand %p4677_p7, %p4676_p0 }
 0xc92   : > { %3549 = dma.done.wait (!%p2956_p4), %s2342_s8, 128  }
 0xc93   : > { %3551 = vsyncadd (!%p2956_p4), %s2342_s8, 4294967168  ;;  %s2351_s0 = scalar_lea.sflag [#allocation27], %s2341_s17 }
 0xc94   : > { %3553 = dma.done.wait (!%p2956_p4), %s2351_s0, 128  }
 0xc95   : > { %3555 = vsyncadd (!%p2956_p4), %s2351_s0, 4294967168  ;;  %s4678_s30 = sld [smem:[#allocation40_spill]]  ;;  %s4679_s23 = sld [smem:[#allocation39_spill]] }
 0xc96   : > { %s4680_s6 = sld [smem:[#allocation41_spill]]  ;;  %s4681_s29 = smov %s3562_s2 }
 0xc9b   : > { %p51_p9 = scmp.ge.s32.totalorder %s4678_s30, 4   ;;  %s4682_s2 = smov %s4679_s23 }
 0xc9d   :  { %53 = sbr.rel (!%p51_p9) target bundleno = 39 (0x27), region = 256 }
 0xca4   :  { %2356 = vsyncpa [#allocation4], 1 }
 0xca5   :  { %2358 = vsyncpa [#allocation4 + $0x1], 1 }
 0xca6   :  { %2359 = vsyncpa [#allocation8], 1 }
 0xca7   :  { %2361 = vsyncpa [#allocation8 + $0x1], 1 }
 0xca8   :  { %2362 = vsyncpa [#allocation12], 1 }
 0xca9   :  { %2363 = vsyncpa [#allocation15], 1 }
 0xcaa   :  { %2364 = vsyncpa [#allocation18], 1 }
 0xcab   :  { %2365 = vsyncpa [#allocation21], 1 }
 0xcac   :  { %2366 = vsyncpa [#allocation24], 1 }
 0xcad   :  { %2367 = vsyncpa [#allocation5], 1 }
 0xcae   :  { %2369 = vsyncpa [#allocation5 + $0x1], 1 }
 0xcaf   :  { %2370 = vsyncpa [#allocation27], 1 }
 0xcb0   :  { %2372 = vsyncpa [#allocation27 + $0x1], 1 }
 0xcb1   :  { %2373 = vsyncpa [#allocation6], 1 }
 0xcb2   :  { %2375 = vsyncpa [#allocation6 + $0x1], 1 }

</bundles_post_ra>
